<compile_context>
chip_gen: v6e
topology: v6e:2x2x1
jax: 0.10.0
libtpu: 0.0.40
codegen_flags: <defaults>
</compile_context>

<pallas_src>
import math
from functools import partial

import jax
import jax.numpy as jnp
from jax.experimental import pallas as pl
from jax.experimental.pallas import tpu as pltpu

EPS = 1e-5


def _basic_block_kernel(x_ref, bw1_ref, bw2_ref, r1_ref, c1_ref, r2_ref,
                        c2_ref, g1_ref, be1_ref, g2_ref, be2_ref, o_ref, *, H):
    # x_ref:   (N*H, W*Cp) input row slab, lanes = (w, c)
    # bw1_ref: (3*W*Cp, W*Mp) ky-fused banded conv1 weights
    # bw2_ref: (3*W*Mp, W*Cp) ky-fused banded conv2 weights
    # r*_ref:  (W*Cch, Cch)  per-channel reduce (already / count)
    # c*_ref:  (Cch, W*Cch)  per-channel lane broadcast
    # g*/be*:  (1, Cch)      gamma / beta
    # o_ref:   (N*H, W*Cp)   output row slab
    x = x_ref[...]                                        # (R, W*Cp) f32
    R = x.shape[0]

    # Per-image row-boundary masks (rows where the rolled neighbour is invalid).
    h = jax.lax.broadcasted_iota(jnp.int32, (R, 1), 0) % H
    not_top = h != 0
    not_bot = h != (H - 1)

    def shifted(t):
        # (R, L) -> (R, 3L): [row-1 | row | row+1] with a per-image zero halo.
        up = jnp.where(not_top, pltpu.roll(t, shift=1, axis=0), 0.0)
        dn = jnp.where(not_bot, pltpu.roll(t, shift=R - 1, axis=0), 0.0)
        return jnp.concatenate([up, t, dn], axis=1)

    def bn_scale_bias(acc, r_ref, c_ref, g_ref, b_ref):
        # Training-mode batch stats: one 2-row matmul gives per-channel
        # [sum(x), sum(x^2)]; affine folded into per-lane scale/bias.
        s = jnp.concatenate([jnp.sum(acc, axis=0, keepdims=True),
                             jnp.sum(acc * acc, axis=0, keepdims=True)],
                            axis=0)                       # (2, W*Cch)
        st = jnp.dot(s, r_ref[...], preferred_element_type=jnp.float32)
        mean = st[0:1, :]
        var = st[1:2, :] - mean * mean
        scale = g_ref[...] * jax.lax.rsqrt(var + EPS)
        bias = b_ref[...] - mean * scale
        sb = jnp.dot(jnp.concatenate([scale, bias], axis=0), c_ref[...],
                     preferred_element_type=jnp.float32)  # (2, W*Cch)
        return sb[0:1, :], sb[1:2, :]

    # ---- conv1 (single deep-K MXU matmul) -> BN1 -> ReLU ----
    acc1 = jnp.dot(shifted(x), bw1_ref[...], preferred_element_type=jnp.float32)
    sc1, bi1 = bn_scale_bias(acc1, r1_ref, c1_ref, g1_ref, be1_ref)
    y = jnp.maximum(acc1 * sc1 + bi1, 0.0)                # (R, W*Mp)

    # ---- conv2 -> BN2 -> +residual (x already loaded) -> ReLU ----
    acc2 = jnp.dot(shifted(y), bw2_ref[...], preferred_element_type=jnp.float32)
    sc2, bi2 = bn_scale_bias(acc2, r2_ref, c2_ref, g2_ref, be2_ref)
    o_ref[...] = jnp.maximum(acc2 * sc2 + bi2 + x, 0.0)


def _band_matrix(w_hwio, W):
    """w_hwio: (3, 3, Ci, Co) -> (3*W*Ci, W*Co) ky-fused, W-banded matrix with
    B[ky*W*Ci + w_in*Ci + ci, w_out*Co + co] = w[ky, w_in - w_out + 1, ci, co]
    (zero outside the 3-tap band), so the whole 3x3 conv — kx taps and W zero
    padding included — is a single matmul against the 3 row-shifted slabs."""
    _, _, Ci, Co = w_hwio.shape
    win = jnp.arange(W)[:, None]
    wout = jnp.arange(W)[None, :]
    kx = win - wout + 1
    valid = ((kx >= 0) & (kx <= 2)).astype(w_hwio.dtype)
    kxc = jnp.clip(kx, 0, 2)
    mats = []
    for ky in range(3):
        b = w_hwio[ky][kxc] * valid[:, :, None, None]     # (W, W, Ci, Co)
        b = jnp.transpose(b, (0, 2, 1, 3)).reshape(W * Ci, W * Co)
        mats.append(b)
    return jnp.concatenate(mats, axis=0)                  # (3*W*Ci, W*Co)


def _reduce_bcast_matrices(W, Cch, count):
    """Factored channel averaging: (W*Cch, Cch) reduce (includes /count) and
    (Cch, W*Cch) lane broadcast for interleaved (w, c) lanes."""
    idx = jnp.arange(W * Cch) % Cch
    ch = jnp.arange(Cch)
    r = (idx[:, None] == ch[None, :]).astype(jnp.float32) / count
    c = (ch[:, None] == idx[None, :]).astype(jnp.float32)
    return r, c


def _ceil_to(v, q):
    return ((v + q - 1) // q) * q


@jax.jit
def basic_block(x_nchw, w1, w2, g1, b1, g2, b2):
    """x_nchw: (N, C, H, W) f32.  w1: (3,3,C,M) HWIO, w2: (3,3,M,C) HWIO."""
    N, C, H, W = x_nchw.shape
    M = w1.shape[-1]
    q = 128 // math.gcd(W, 128)           # channel pad so W*Cch % 128 == 0
    Cp, Mp = _ceil_to(C, q), _ceil_to(M, q)
    count = float(N * H * W)

    # Glue: NCHW -> NHWC row slab with zero-padded channels (single copy of x;
    # the residual is re-read from this slab inside the kernel).
    # TODO(synk): accept NHWC directly at production shapes to drop this pass.
    x = jnp.transpose(x_nchw, (0, 2, 3, 1))
    x = jnp.pad(x, ((0, 0), (0, 0), (0, 0), (0, Cp - C)))
    x_rows = x.reshape(N * H, W * Cp)

    w1p = jnp.pad(w1, ((0, 0), (0, 0), (0, Cp - C), (0, Mp - M)))
    w2p = jnp.pad(w2, ((0, 0), (0, 0), (0, Mp - M), (0, Cp - C)))
    bw1 = _band_matrix(w1p, W)                            # (3*W*Cp, W*Mp)
    bw2 = _band_matrix(w2p, W)                            # (3*W*Mp, W*Cp)
    r1, c1 = _reduce_bcast_matrices(W, Mp, count)
    r2, c2 = _reduce_bcast_matrices(W, Cp, count)
    # Pad channels: gamma = beta = 0 so BN of an all-zero channel stays zero.
    g1p = jnp.pad(g1, (0, Mp - M)).reshape(1, Mp)
    b1p = jnp.pad(b1, (0, Mp - M)).reshape(1, Mp)
    g2p = jnp.pad(g2, (0, Cp - C)).reshape(1, Cp)
    b2p = jnp.pad(b2, (0, Cp - C)).reshape(1, Cp)

    vmem = pl.BlockSpec(memory_space=pltpu.MemorySpace.VMEM)
    out_rows = pl.pallas_call(
        partial(_basic_block_kernel, H=H),
        out_shape=jax.ShapeDtypeStruct((N * H, W * Cp), jnp.float32),
        in_specs=[vmem] * 11,
        out_specs=vmem,
    )(x_rows, bw1, bw2, r1, c1, r2, c2, g1p, b1p, g2p, b2p)

    out = out_rows.reshape(N, H, W, Cp)[..., :C]
    return jnp.transpose(out, (0, 3, 1, 2))               # back to NCHW


def reference(x_nchw, w1, w2, g1, b1, g2, b2):
    """Pure-JAX reference matching the PyTorch forward (training-mode BN)."""
    x = jnp.transpose(x_nchw, (0, 2, 3, 1))

    def conv(a, w):
        return jax.lax.conv_general_dilated(
            a, w, (1, 1), ((1, 1), (1, 1)),
            dimension_numbers=("NHWC", "HWIO", "NHWC"),
            precision=jax.lax.Precision.HIGHEST)

    def bn(a, g, b):
        m = jnp.mean(a, axis=(0, 1, 2), keepdims=True)
        v = jnp.mean((a - m) ** 2, axis=(0, 1, 2), keepdims=True)
        return (a - m) * jax.lax.rsqrt(v + EPS) * g + b

    y = jnp.maximum(bn(conv(x, w1), g1, b1), 0.0)
    z = bn(conv(y, w2), g2, b2)
    out = jnp.maximum(z + x, 0.0)
    return jnp.transpose(out, (0, 3, 1, 2))


if __name__ == "__main__":
    # BasicBlock(inp_channels=4, out_channels=4) (residual requires in == out)
    N, C, H, W = 2, 4, 16, 16
    M = 10  # hidden channels fixed by the module

    key = jax.random.PRNGKey(0)
    k = jax.random.split(key, 7)
    x = jax.random.normal(k[0], (N, C, H, W), jnp.float32)
    w1 = 0.1 * jax.random.normal(k[1], (3, 3, C, M), jnp.float32)   # HWIO
    w2 = 0.1 * jax.random.normal(k[2], (3, 3, M, C), jnp.float32)   # HWIO
    g1 = 1.0 + 0.1 * jax.random.normal(k[3], (M,), jnp.float32)
    b1 = 0.1 * jax.random.normal(k[4], (M,), jnp.float32)
    g2 = 1.0 + 0.1 * jax.random.normal(k[5], (C,), jnp.float32)
    b2 = 0.1 * jax.random.normal(k[6], (C,), jnp.float32)

    out = basic_block(x, w1, w2, g1, b1, g2, b2)
    jax.block_until_ready(out)

    ref = reference(x, w1, w2, g1, b1, g2, b2)
    assert out.shape == (N, C, H, W)
    assert jnp.allclose(out, ref, atol=2e-3, rtol=2e-3), "mismatch vs reference"

    print("KERNEL_OK")
</pallas_src>

<mosaic_0001>
module attributes {stable_mosaic.version = 11 : i64} {
  func.func @_basic_block_kernel(%arg0: memref<32x128xf32, #tpu.memory_space<vmem>>, %arg1: memref<384x256xf32, #tpu.memory_space<vmem>>, %arg2: memref<768x128xf32, #tpu.memory_space<vmem>>, %arg3: memref<256x16xf32, #tpu.memory_space<vmem>>, %arg4: memref<16x256xf32, #tpu.memory_space<vmem>>, %arg5: memref<128x8xf32, #tpu.memory_space<vmem>>, %arg6: memref<8x128xf32, #tpu.memory_space<vmem>>, %arg7: memref<1x16xf32, #tpu.memory_space<vmem>>, %arg8: memref<1x16xf32, #tpu.memory_space<vmem>>, %arg9: memref<1x8xf32, #tpu.memory_space<vmem>>, %arg10: memref<1x8xf32, #tpu.memory_space<vmem>>, %arg11: memref<32x128xf32, #tpu.memory_space<vmem>>) attributes {dimension_semantics = [], scalar_prefetch = 0 : i64, scratch_operands = 0 : i64, tpu.core_type = #tpu.core_type<tc>} {
    %c0 = arith.constant 0 : index
    %c0_0 = arith.constant 0 : index
    %0 = vector.load %arg0[%c0, %c0_0] : memref<32x128xf32, #tpu.memory_space<vmem>>, vector<32x128xf32>
    %1 = tpu.iota {dimensions = array<i32: 0>} : vector<32x1xi32>
    %c16_i32 = arith.constant 16 : i32
    %c0_i32 = arith.constant 0 : i32
    %2 = arith.cmpi eq, %c16_i32, %c0_i32 : i32
    %c1_i32 = arith.constant 1 : i32
    %3 = arith.select %2, %c1_i32, %c16_i32 : i32
    %4 = vector.broadcast %3 : i32 to vector<32x1xi32>
    %5 = arith.remsi %1, %4 : vector<32x1xi32>
    %c0_i32_1 = arith.constant 0 : i32
    %6 = vector.broadcast %c0_i32_1 : i32 to vector<32x1xi32>
    %7 = arith.cmpi ne, %5, %6 : vector<32x1xi32>
    %c0_i32_2 = arith.constant 0 : i32
    %8 = vector.broadcast %c0_i32_2 : i32 to vector<32x1xi32>
    %9 = arith.cmpi slt, %5, %8 : vector<32x1xi32>
    %c0_i32_3 = arith.constant 0 : i32
    %10 = arith.cmpi slt, %3, %c0_i32_3 : i32
    %11 = vector.broadcast %10 : i1 to vector<32x1xi1>
    %12 = vector.broadcast %11 : vector<32x1xi1> to vector<32x1xi1>
    %13 = arith.xori %9, %12 : vector<32x1xi1>
    %14 = arith.andi %13, %7 : vector<32x1xi1>
    %15 = vector.broadcast %3 : i32 to vector<32x1xi32>
    %16 = arith.addi %5, %15 : vector<32x1xi32>
    %17 = arith.select %14, %16, %5 : vector<32x1xi1>, vector<32x1xi32>
    %c0_i32_4 = arith.constant 0 : i32
    %18 = vector.broadcast %c0_i32_4 : i32 to vector<32x1xi32>
    %19 = arith.cmpi ne, %17, %18 : vector<32x1xi32>
    %c15_i32 = arith.constant 15 : i32
    %20 = vector.broadcast %c15_i32 : i32 to vector<32x1xi32>
    %21 = arith.cmpi ne, %17, %20 : vector<32x1xi32>
    %c1_i32_5 = arith.constant 1 : i32
    %22 = tpu.dynamic_rotate %0 by %c1_i32_5 dim 0 : vector<32x128xf32>, i32 -> vector<32x128xf32>
    %cst = arith.constant 0.000000e+00 : f32
    %23 = vector.shape_cast %19 : vector<32x1xi1> to vector<32x1xi1>
    %24 = vector.broadcast %23 : vector<32x1xi1> to vector<32x128xi1>
    %25 = vector.broadcast %cst : f32 to vector<32x128xf32>
    %26 = arith.select %24, %22, %25 : vector<32x128xi1>, vector<32x128xf32>
    %c31_i32 = arith.constant 31 : i32
    %27 = tpu.dynamic_rotate %0 by %c31_i32 dim 0 : vector<32x128xf32>, i32 -> vector<32x128xf32>
    %cst_6 = arith.constant 0.000000e+00 : f32
    %28 = vector.shape_cast %21 : vector<32x1xi1> to vector<32x1xi1>
    %29 = vector.broadcast %28 : vector<32x1xi1> to vector<32x128xi1>
    %30 = vector.broadcast %cst_6 : f32 to vector<32x128xf32>
    %31 = arith.select %29, %27, %30 : vector<32x128xi1>, vector<32x128xf32>
    %32 = tpu.concatenate %26, %0, %31 in 1 : vector<32x128xf32>, vector<32x128xf32>, vector<32x128xf32> -> vector<32x384xf32>
    %c0_7 = arith.constant 0 : index
    %c0_8 = arith.constant 0 : index
    %33 = vector.load %arg1[%c0_7, %c0_8] : memref<384x256xf32, #tpu.memory_space<vmem>>, vector<384x256xf32>
    %cst_9 = arith.constant dense<0.000000e+00> : vector<32x256xf32>
    %34 = tpu.matmul %32, %33, %cst_9 {dimension_numbers = #tpu.dot_dimension_numbers<[1], [0], [0], [1], [0, 0, 1, 1], [], []>} : vector<32x384xf32>, vector<384x256xf32>, vector<32x256xf32> -> vector<32x256xf32>
    %cst_10 = arith.constant dense<0.000000e+00> : vector<256xf32>
    %35 = vector.multi_reduction <add>, %34, %cst_10 [0] : vector<32x256xf32> to vector<256xf32>
    %36 = vector.shape_cast %35 : vector<256xf32> to vector<1x256xf32>
    %37 = arith.mulf %34, %34 : vector<32x256xf32>
    %cst_11 = arith.constant dense<0.000000e+00> : vector<256xf32>
    %38 = vector.multi_reduction <add>, %37, %cst_11 [0] : vector<32x256xf32> to vector<256xf32>
    %39 = vector.shape_cast %38 : vector<256xf32> to vector<1x256xf32>
    %40 = tpu.concatenate %36, %39 in 0 : vector<1x256xf32>, vector<1x256xf32> -> vector<2x256xf32>
    %c0_12 = arith.constant 0 : index
    %c0_13 = arith.constant 0 : index
    %41 = vector.load %arg3[%c0_12, %c0_13] : memref<256x16xf32, #tpu.memory_space<vmem>>, vector<256x16xf32>
    %cst_14 = arith.constant dense<0.000000e+00> : vector<2x16xf32>
    %42 = tpu.matmul %40, %41, %cst_14 {dimension_numbers = #tpu.dot_dimension_numbers<[1], [0], [0], [1], [0, 0, 1, 1], [], []>} : vector<2x256xf32>, vector<256x16xf32>, vector<2x16xf32> -> vector<2x16xf32>
    %43 = vector.extract_strided_slice %42 {offsets = [0, 0], sizes = [1, 16], strides = [1, 1]} : vector<2x16xf32> to vector<1x16xf32>
    %44 = vector.extract_strided_slice %42 {offsets = [1, 0], sizes = [1, 16], strides = [1, 1]} : vector<2x16xf32> to vector<1x16xf32>
    %45 = arith.mulf %43, %43 : vector<1x16xf32>
    %46 = arith.subf %44, %45 : vector<1x16xf32>
    %c0_15 = arith.constant 0 : index
    %c0_16 = arith.constant 0 : index
    %47 = vector.load %arg7[%c0_15, %c0_16] : memref<1x16xf32, #tpu.memory_space<vmem>>, vector<1x16xf32>
    %cst_17 = arith.constant 9.99999974E-6 : f32
    %48 = vector.broadcast %cst_17 : f32 to vector<1x16xf32>
    %49 = arith.addf %46, %48 : vector<1x16xf32>
    %50 = math.rsqrt %49 : vector<1x16xf32>
    %51 = arith.mulf %47, %50 : vector<1x16xf32>
    %c0_18 = arith.constant 0 : index
    %c0_19 = arith.constant 0 : index
    %52 = vector.load %arg8[%c0_18, %c0_19] : memref<1x16xf32, #tpu.memory_space<vmem>>, vector<1x16xf32>
    %53 = arith.mulf %43, %51 : vector<1x16xf32>
    %54 = arith.subf %52, %53 : vector<1x16xf32>
    %55 = tpu.concatenate %51, %54 in 0 : vector<1x16xf32>, vector<1x16xf32> -> vector<2x16xf32>
    %c0_20 = arith.constant 0 : index
    %c0_21 = arith.constant 0 : index
    %56 = vector.load %arg4[%c0_20, %c0_21] : memref<16x256xf32, #tpu.memory_space<vmem>>, vector<16x256xf32>
    %cst_22 = arith.constant dense<0.000000e+00> : vector<2x256xf32>
    %57 = tpu.matmul %55, %56, %cst_22 {dimension_numbers = #tpu.dot_dimension_numbers<[1], [0], [0], [1], [0, 0, 1, 1], [], []>} : vector<2x16xf32>, vector<16x256xf32>, vector<2x256xf32> -> vector<2x256xf32>
    %58 = vector.extract_strided_slice %57 {offsets = [0, 0], sizes = [1, 256], strides = [1, 1]} : vector<2x256xf32> to vector<1x256xf32>
    %59 = vector.extract_strided_slice %57 {offsets = [1, 0], sizes = [1, 256], strides = [1, 1]} : vector<2x256xf32> to vector<1x256xf32>
    %60 = vector.broadcast %58 : vector<1x256xf32> to vector<32x256xf32>
    %61 = arith.mulf %34, %60 : vector<32x256xf32>
    %62 = vector.broadcast %59 : vector<1x256xf32> to vector<32x256xf32>
    %63 = arith.addf %61, %62 : vector<32x256xf32>
    %cst_23 = arith.constant 0.000000e+00 : f32
    %64 = vector.broadcast %cst_23 : f32 to vector<32x256xf32>
    %65 = arith.maximumf %63, %64 : vector<32x256xf32>
    %c1_i32_24 = arith.constant 1 : i32
    %66 = tpu.dynamic_rotate %65 by %c1_i32_24 dim 0 : vector<32x256xf32>, i32 -> vector<32x256xf32>
    %cst_25 = arith.constant 0.000000e+00 : f32
    %67 = vector.shape_cast %19 : vector<32x1xi1> to vector<32x1xi1>
    %68 = vector.broadcast %67 : vector<32x1xi1> to vector<32x256xi1>
    %69 = vector.broadcast %cst_25 : f32 to vector<32x256xf32>
    %70 = arith.select %68, %66, %69 : vector<32x256xi1>, vector<32x256xf32>
    %c31_i32_26 = arith.constant 31 : i32
    %71 = tpu.dynamic_rotate %65 by %c31_i32_26 dim 0 : vector<32x256xf32>, i32 -> vector<32x256xf32>
    %cst_27 = arith.constant 0.000000e+00 : f32
    %72 = vector.shape_cast %21 : vector<32x1xi1> to vector<32x1xi1>
    %73 = vector.broadcast %72 : vector<32x1xi1> to vector<32x256xi1>
    %74 = vector.broadcast %cst_27 : f32 to vector<32x256xf32>
    %75 = arith.select %73, %71, %74 : vector<32x256xi1>, vector<32x256xf32>
    %76 = tpu.concatenate %70, %65, %75 in 1 : vector<32x256xf32>, vector<32x256xf32>, vector<32x256xf32> -> vector<32x768xf32>
    %c0_28 = arith.constant 0 : index
    %c0_29 = arith.constant 0 : index
    %77 = vector.load %arg2[%c0_28, %c0_29] : memref<768x128xf32, #tpu.memory_space<vmem>>, vector<768x128xf32>
    %cst_30 = arith.constant dense<0.000000e+00> : vector<32x128xf32>
    %78 = tpu.matmul %76, %77, %cst_30 {dimension_numbers = #tpu.dot_dimension_numbers<[1], [0], [0], [1], [0, 0, 1, 1], [], []>} : vector<32x768xf32>, vector<768x128xf32>, vector<32x128xf32> -> vector<32x128xf32>
    %cst_31 = arith.constant dense<0.000000e+00> : vector<128xf32>
    %79 = vector.multi_reduction <add>, %78, %cst_31 [0] : vector<32x128xf32> to vector<128xf32>
    %80 = vector.shape_cast %79 : vector<128xf32> to vector<1x128xf32>
    %81 = arith.mulf %78, %78 : vector<32x128xf32>
    %cst_32 = arith.constant dense<0.000000e+00> : vector<128xf32>
    %82 = vector.multi_reduction <add>, %81, %cst_32 [0] : vector<32x128xf32> to vector<128xf32>
    %83 = vector.shape_cast %82 : vector<128xf32> to vector<1x128xf32>
    %84 = tpu.concatenate %80, %83 in 0 : vector<1x128xf32>, vector<1x128xf32> -> vector<2x128xf32>
    %c0_33 = arith.constant 0 : index
    %c0_34 = arith.constant 0 : index
    %85 = vector.load %arg5[%c0_33, %c0_34] : memref<128x8xf32, #tpu.memory_space<vmem>>, vector<128x8xf32>
    %cst_35 = arith.constant dense<0.000000e+00> : vector<2x8xf32>
    %86 = tpu.matmul %84, %85, %cst_35 {dimension_numbers = #tpu.dot_dimension_numbers<[1], [0], [0], [1], [0, 0, 1, 1], [], []>} : vector<2x128xf32>, vector<128x8xf32>, vector<2x8xf32> -> vector<2x8xf32>
    %87 = vector.extract_strided_slice %86 {offsets = [0, 0], sizes = [1, 8], strides = [1, 1]} : vector<2x8xf32> to vector<1x8xf32>
    %88 = vector.extract_strided_slice %86 {offsets = [1, 0], sizes = [1, 8], strides = [1, 1]} : vector<2x8xf32> to vector<1x8xf32>
    %89 = arith.mulf %87, %87 : vector<1x8xf32>
    %90 = arith.subf %88, %89 : vector<1x8xf32>
    %c0_36 = arith.constant 0 : index
    %c0_37 = arith.constant 0 : index
    %91 = vector.load %arg9[%c0_36, %c0_37] : memref<1x8xf32, #tpu.memory_space<vmem>>, vector<1x8xf32>
    %cst_38 = arith.constant 9.99999974E-6 : f32
    %92 = vector.broadcast %cst_38 : f32 to vector<1x8xf32>
    %93 = arith.addf %90, %92 : vector<1x8xf32>
    %94 = math.rsqrt %93 : vector<1x8xf32>
    %95 = arith.mulf %91, %94 : vector<1x8xf32>
    %c0_39 = arith.constant 0 : index
    %c0_40 = arith.constant 0 : index
    %96 = vector.load %arg10[%c0_39, %c0_40] : memref<1x8xf32, #tpu.memory_space<vmem>>, vector<1x8xf32>
    %97 = arith.mulf %87, %95 : vector<1x8xf32>
    %98 = arith.subf %96, %97 : vector<1x8xf32>
    %99 = tpu.concatenate %95, %98 in 0 : vector<1x8xf32>, vector<1x8xf32> -> vector<2x8xf32>
    %c0_41 = arith.constant 0 : index
    %c0_42 = arith.constant 0 : index
    %100 = vector.load %arg6[%c0_41, %c0_42] : memref<8x128xf32, #tpu.memory_space<vmem>>, vector<8x128xf32>
    %cst_43 = arith.constant dense<0.000000e+00> : vector<2x128xf32>
    %101 = tpu.matmul %99, %100, %cst_43 {dimension_numbers = #tpu.dot_dimension_numbers<[1], [0], [0], [1], [0, 0, 1, 1], [], []>} : vector<2x8xf32>, vector<8x128xf32>, vector<2x128xf32> -> vector<2x128xf32>
    %102 = vector.extract_strided_slice %101 {offsets = [0, 0], sizes = [1, 128], strides = [1, 1]} : vector<2x128xf32> to vector<1x128xf32>
    %103 = vector.extract_strided_slice %101 {offsets = [1, 0], sizes = [1, 128], strides = [1, 1]} : vector<2x128xf32> to vector<1x128xf32>
    %104 = vector.broadcast %102 : vector<1x128xf32> to vector<32x128xf32>
    %105 = arith.mulf %78, %104 : vector<32x128xf32>
    %106 = vector.broadcast %103 : vector<1x128xf32> to vector<32x128xf32>
    %107 = arith.addf %105, %106 : vector<32x128xf32>
    %108 = arith.addf %107, %0 : vector<32x128xf32>
    %cst_44 = arith.constant 0.000000e+00 : f32
    %109 = vector.broadcast %cst_44 : f32 to vector<32x128xf32>
    %110 = arith.maximumf %108, %109 : vector<32x128xf32>
    %c0_45 = arith.constant 0 : index
    %c0_46 = arith.constant 0 : index
    %111 = vector.load %arg11[%c0_45, %c0_46] : memref<32x128xf32, #tpu.memory_space<vmem>>, vector<32x128xf32>
    tpu.vector_store %arg11[%c0_45, %c0_46], %110 {strides = array<i32>} : memref<32x128xf32, #tpu.memory_space<vmem>>, vector<32x128xf32>,
    return
  }
}

</mosaic_0001>

<bundles_post_ra>
// kernel: basic_block.1
= control target key start
LH: loop header
LB: loop body
LE: loop exit
PB: predicated region body
PF: predicated region fallthrough
CT: control target
= control target key end

     0   :  { %v1625_v3 = vmov 0.0   ;;  %v42_v53 = vlaneseq  ;;  %vm463_vm6 = vcmask 1040384   ;;  %vm608_vm7 = vcmask 130048   ;;  %s2747_s1 = inlined_call_operand.vmem [shape: f32[384,256], index: 1, kind: input, shape index: {}]   ;;  %s2748_s0 = inlined_call_operand.vmem [shape: f32[32,128], index: 0, kind: input, shape index: {}]   ;;  %s2749_s3 = inlined_call_operand.vmem [shape: f32[256,16], index: 3, kind: input, shape index: {}]   ;;  %s2750_s4 = inlined_call_operand.vmem [shape: f32[16,256], index: 4, kind: input, shape index: {}]   ;;  %s2751_s2 = inlined_call_operand.vmem [shape: f32[768,128], index: 2, kind: input, shape index: {}]   ;;  %s2752_s7 = inlined_call_operand.vmem [shape: f32[1,16], index: 7, kind: input, shape index: {}]   ;;  %s2753_s8 = inlined_call_operand.vmem [shape: f32[1,16], index: 8, kind: input, shape index: {}]   ;;  %s2754_s5 = inlined_call_operand.vmem [shape: f32[128,8], index: 5, kind: input, shape index: {}]   ;;  %s2755_s6 = inlined_call_operand.vmem [shape: f32[8,128], index: 6, kind: input, shape index: {}]   ;;  %s2756_s9 = inlined_call_operand.vmem [shape: f32[1,8], index: 9, kind: input, shape index: {}]   ;;  %s2757_s10 = inlined_call_operand.vmem [shape: f32[1,8], index: 10, kind: input, shape index: {}]   ;;  %s2758_s11 = inlined_call_operand.vmem [shape: f32[32,128], index: 11, kind: output, shape index: {}]  }
   0x1   :  { %v176_v0 = vld [vmem:[%s2747_s1 + $0xf8] sm:$0xff]  ;;  %v175_v1 = vld [vmem:[%s2747_s1 + $0xf0] sm:$0xff]  ;;  %v174_v2 = vld [vmem:[%s2747_s1 + $0xe8] sm:$0xff]  ;;  %394 = vmatprep.mubr.f32.mxu1 %v1625_v3  ;;  %vm1627_vm8 = vmmov 0   ;;  %vm1268_vm9 = vcmask 64512  }
   0x2   :  { %241 = vmatprep.subr.mxu0 %v176_v0  ;;  %v173_v4 = vld [vmem:[%s2747_s1 + $0xe0] sm:$0xff]  ;;  %v172_v5 = vld [vmem:[%s2747_s1 + $0xd8] sm:$0xff]  ;;  %v171_v6 = vld [vmem:[%s2747_s1 + $0xd0] sm:$0xff]  ;;  %v1872_v63 = vshrl.u32 %v42_v53, 7 }
   0x3   :  { %242 = vmatpush1.msra.mxu0 %v175_v1  ;;  %v170_v7 = vld [vmem:[%s2747_s1 + $0xc8] sm:$0xff]  ;;  %v169_v8 = vld [vmem:[%s2747_s1 + $0xc0] sm:$0xff]  ;;  %v168_v9 = vld [vmem:[%s2747_s1 + $0xb8] sm:$0xff] }
   0x4   :  { %243 = vmatprep.subr.mxu0 %v174_v2  ;;  %v167_v10 = vld [vmem:[%s2747_s1 + $0xb0] sm:$0xff]  ;;  %v166_v11 = vld [vmem:[%s2747_s1 + $0xa8] sm:$0xff]  ;;  %v165_v12 = vld [vmem:[%s2747_s1 + $0xa0] sm:$0xff]  ;;  %vm128_vm0 = vcmp.lt.s32.totalorder %v1872_v63, 7  ;;  %vm107_vm3 = vcmp.lt.s32.totalorder %v1872_v63, 1 }
   0x5   :  { %244 = vmatpush1.msra.mxu0 %v173_v4  ;;  %v164_v13 = vld [vmem:[%s2747_s1 + $0x98] sm:$0xff]  ;;  %v163_v15 = vld [vmem:[%s2747_s1 + $0x90] sm:$0xff]  ;;  %v238_v17 = vld [vmem:[%s2747_s1 + $0x2e8] sm:$0xff] }
   0x6   :  { %245 = vmatprep.subr.mxu0 %v172_v5  ;;  %v240_v14 = vld [vmem:[%s2747_s1 + $0x2f8] sm:$0xff]  ;;  %v239_v16 = vld [vmem:[%s2747_s1 + $0x2f0] sm:$0xff]  ;;  %v162_v18 = vld [vmem:[%s2747_s1 + $0x88] sm:$0xff] }
   0x7   :  { %246 = vmatpush1.msra.mxu0 %v171_v6  ;;  %330 = vmatprep.subr.mxu1 %v240_v14  ;;  %v237_v19 = vld [vmem:[%s2747_s1 + $0x2e0] sm:$0xff]  ;;  %v236_v21 = vld [vmem:[%s2747_s1 + $0x2d8] sm:$0xff]  ;;  %v235_v22 = vld [vmem:[%s2747_s1 + $0x2d0] sm:$0xff] }
   0x8   :  { %247 = vmatprep.subr.mxu0 %v170_v7  ;;  %331 = vmatpush1.msra.mxu1 %v239_v16  ;;  %v161_v20 = vld [vmem:[%s2747_s1 + $0x80] sm:$0xff]  ;;  %v160_v23 = vld [vmem:[%s2747_s1 + $0x78] sm:$0xff]  ;;  %v234_v24 = vld [vmem:[%s2747_s1 + $0x2c8] sm:$0xff] }
   0x9   :  { %248 = vmatpush1.msra.mxu0 %v169_v8  ;;  %332 = vmatprep.subr.mxu1 %v238_v17  ;;  %v159_v25 = vld [vmem:[%s2747_s1 + $0x70] sm:$0xff]  ;;  %v233_v26 = vld [vmem:[%s2747_s1 + $0x2c0] sm:$0xff]  ;;  %v158_v27 = vld [vmem:[%s2747_s1 + $0x68] sm:$0xff] }
   0xa   :  { %249 = vmatprep.subr.mxu0 %v168_v9  ;;  %333 = vmatpush1.msra.mxu1 %v237_v19  ;;  %v232_v28 = vld [vmem:[%s2747_s1 + $0x2b8] sm:$0xff]  ;;  %v157_v29 = vld [vmem:[%s2747_s1 + $0x60] sm:$0xff]  ;;  %v231_v30 = vld [vmem:[%s2747_s1 + $0x2b0] sm:$0xff] }
   0xb   :  { %250 = vmatpush1.msra.mxu0 %v167_v10  ;;  %334 = vmatprep.subr.mxu1 %v236_v21  ;;  %v156_v31 = vld [vmem:[%s2747_s1 + $0x58] sm:$0xff]  ;;  %v230_v32 = vld [vmem:[%s2747_s1 + $0x2a8] sm:$0xff]  ;;  %v155_v33 = vld [vmem:[%s2747_s1 + $0x50] sm:$0xff] }
   0xc   :  { %251 = vmatprep.subr.mxu0 %v166_v11  ;;  %335 = vmatpush1.msra.mxu1 %v235_v22  ;;  %v229_v34 = vld [vmem:[%s2747_s1 + $0x2a0] sm:$0xff]  ;;  %v154_v35 = vld [vmem:[%s2747_s1 + $0x48] sm:$0xff]  ;;  %v228_v36 = vld [vmem:[%s2747_s1 + $0x298] sm:$0xff] }
   0xd   :  { %252 = vmatpush1.msra.mxu0 %v165_v12  ;;  %336 = vmatprep.subr.mxu1 %v234_v24  ;;  %v153_v37 = vld [vmem:[%s2747_s1 + $0x40] sm:$0xff]  ;;  %v227_v38 = vld [vmem:[%s2747_s1 + $0x290] sm:$0xff]  ;;  %v152_v39 = vld [vmem:[%s2747_s1 + $0x38] sm:$0xff]  ;;  %v44_v12 = vadd.s32 8, %v1872_v63 }
   0xe   :  { %253 = vmatprep.subr.mxu0 %v164_v13  ;;  %337 = vmatpush1.msra.mxu1 %v233_v26  ;;  %v226_v40 = vld [vmem:[%s2747_s1 + $0x288] sm:$0xff]  ;;  %v151_v41 = vld [vmem:[%s2747_s1 + $0x30] sm:$0xff]  ;;  %v225_v42 = vld [vmem:[%s2747_s1 + $0x280] sm:$0xff] }
   0xf   :  { %254 = vmatpush1.msra.mxu0 %v163_v15  ;;  %338 = vmatprep.subr.mxu1 %v232_v28  ;;  %v150_v43 = vld [vmem:[%s2747_s1 + $0x28] sm:$0xff]  ;;  %v224_v44 = vld [vmem:[%s2747_s1 + $0x278] sm:$0xff]  ;;  %v149_v45 = vld [vmem:[%s2747_s1 + $0x20] sm:$0xff]  ;;  %v58_v22 = vand.u32 15, %v44_v12 }
  0x10   :  { %255 = vmatprep.subr.mxu0 %v162_v18  ;;  %339 = vmatpush1.msra.mxu1 %v231_v30  ;;  %v223_v46 = vld [vmem:[%s2747_s1 + $0x270] sm:$0xff]  ;;  %v148_v47 = vld [vmem:[%s2747_s1 + $0x18] sm:$0xff]  ;;  %v222_v48 = vld [vmem:[%s2747_s1 + $0x268] sm:$0xff] }
  0x11   :  { %256 = vmatpush1.msra.mxu0 %v161_v20  ;;  %340 = vmatprep.subr.mxu1 %v230_v32  ;;  %v147_v49 = vld [vmem:[%s2747_s1 + $0x10] sm:$0xff]  ;;  %v221_v50 = vld [vmem:[%s2747_s1 + $0x260] sm:$0xff]  ;;  %v146_v51 = vld [vmem:[%s2747_s1 + $0x8] sm:$0xff]  ;;  %vm1958_vm1 = vcmp.ne.s32.totalorder %v58_v22, 15  ;;  %v46_v32 = vadd.s32 24, %v1872_v63 }
  0x12   :  { %257 = vmatprep.subr.mxu0 %v160_v23  ;;  %341 = vmatpush1.msra.mxu1 %v229_v34  ;;  %v220_v52 = vld [vmem:[%s2747_s1 + $0x258] sm:$0xff]  ;;  %v145_v54 = vld [vmem:[%s2747_s1] sm:$0xff]  ;;  %v219_v55 = vld [vmem:[%s2747_s1 + $0x250] sm:$0xff] }
  0x13   :  { %258 = vmatpush1.msra.mxu0 %v159_v25  ;;  %342 = vmatprep.subr.mxu1 %v228_v36  ;;  %v208_v56 = vld [vmem:[%s2747_s1 + $0x1f8] sm:$0xff]  ;;  %v218_v57 = vld [vmem:[%s2747_s1 + $0x248] sm:$0xff]  ;;  %v207_v58 = vld [vmem:[%s2747_s1 + $0x1f0] sm:$0xff] }
  0x14   :  { %259 = vmatprep.subr.mxu0 %v158_v27  ;;  %343 = vmatpush1.msra.mxu1 %v227_v38  ;;  %v217_v59 = vld [vmem:[%s2747_s1 + $0x240] sm:$0xff]  ;;  %v206_v60 = vld [vmem:[%s2747_s1 + $0x1e8] sm:$0xff]  ;;  %v216_v62 = vld [vmem:[%s2747_s1 + $0x238] sm:$0xff]  ;;  %v72_v38 = vand.u32 15, %v46_v32 }
  0x15   :  { %260 = vmatpush1.msra.mxu0 %v157_v29  ;;  %344 = vmatprep.subr.mxu1 %v226_v40  ;;  %v205_v61 = vld [vmem:[%s2747_s1 + $0x1e0] sm:$0xff]  ;;  %v215_v0 = vld [vmem:[%s2747_s1 + $0x230] sm:$0xff]  ;;  %v1885_v2 = vld [vmem:[%s2748_s0 + $0x8] sm:$0xff] }
  0x16   :  { %261 = vmatprep.subr.mxu0 %v156_v31  ;;  %345 = vmatpush1.msra.mxu1 %v225_v42  ;;  %v1880_v1 = vld [vmem:[%s2748_s0] sm:$0xff]  ;;  %v204_v4 = vld [vmem:[%s2747_s1 + $0x1d8] sm:$0xff]  ;;  %v214_v5 = vld [vmem:[%s2747_s1 + $0x228] sm:$0xff]  ;;  %v125_v11 = vrot.slane %v1885_v2, 1  ;;  %vm1997_vm2 = vcmp.ne.s32.totalorder %v72_v38, 15 }
  0x17   :  { %262 = vmatpush1.msra.mxu0 %v155_v33  ;;  %346 = vmatprep.subr.mxu1 %v224_v44  ;;  %v203_v6 = vld [vmem:[%s2747_s1 + $0x1d0] sm:$0xff]  ;;  %v213_v7 = vld [vmem:[%s2747_s1 + $0x220] sm:$0xff]  ;;  %v202_v8 = vld [vmem:[%s2747_s1 + $0x1c8] sm:$0xff]  ;;  %v124_v10 = vrot.slane %v1880_v1, 1 }
  0x18   :  { %263 = vmatprep.subr.mxu0 %v154_v35  ;;  %347 = vmatpush1.msra.mxu1 %v223_v46  ;;  %v212_v9 = vld [vmem:[%s2747_s1 + $0x218] sm:$0xff]  ;;  %v201_v13 = vld [vmem:[%s2747_s1 + $0x1c0] sm:$0xff]  ;;  %v211_v14 = vld [vmem:[%s2747_s1 + $0x210] sm:$0xff] }
  0x19   :  { %264 = vmatpush1.msra.mxu0 %v153_v37  ;;  %348 = vmatprep.subr.mxu1 %v222_v48  ;;  %v1918_v15 = vld [vmem:[%s2748_s0 + $0x10] sm:$0xff]  ;;  %v200_v16 = vld [vmem:[%s2747_s1 + $0x1b8] sm:$0xff]  ;;  %v210_v17 = vld [vmem:[%s2747_s1 + $0x208] sm:$0xff]  ;;  %v131_v21 = vsel %vm128_vm0, %v124_v10, %v125_v11 }
  0x1a   :  { %265 = vmatprep.subr.mxu0 %v152_v39  ;;  %349 = vmatpush1.msra.mxu1 %v221_v50  ;;  %v199_v18 = vld [vmem:[%s2747_s1 + $0x1b0] sm:$0xff]  ;;  %v209_v19 = vld [vmem:[%s2747_s1 + $0x200] sm:$0xff]  ;;  %v198_v20 = vld [vmem:[%s2747_s1 + $0x1a8] sm:$0xff]  ;;  %v126_v23 = vrot.slane %v1918_v15, 1 }
  0x1b   :  { %266 = vmatpush1.msra.mxu0 %v151_v41  ;;  %350 = vmatprep.subr.mxu1 %v220_v52  ;;  %v197_v24 = vld [vmem:[%s2747_s1 + $0x1a0] sm:$0xff]  ;;  %v196_v25 = vld [vmem:[%s2747_s1 + $0x198] sm:$0xff]  ;;  %v195_v26 = vld [vmem:[%s2747_s1 + $0x190] sm:$0xff]  ;;  %v103_v52 = vrot.slane %v1880_v1, 7 }
  0x1c   :  { %267 = vmatprep.subr.mxu0 %v150_v43  ;;  %351 = vmatpush1.msra.mxu1 %v219_v55  ;;  %v1952_v27 = vld [vmem:[%s2748_s0 + $0x18] sm:$0xff]  ;;  %v194_v28 = vld [vmem:[%s2747_s1 + $0x188] sm:$0xff]  ;;  %v130_v30 = vsel %vm128_vm0, %v125_v11, %v126_v23  ;;  %v193_v33 = vld [vmem:[%s2747_s1 + $0x180] sm:$0xff] }
  0x1d   :  { %268 = vmatpush1.msra.mxu0 %v149_v45  ;;  %352 = vmatprep.subr.mxu1 %v218_v57  ;;  %v127_v31 = vrot.slane %v1952_v27, 1  ;;  %v192_v34 = vld [vmem:[%s2747_s1 + $0x178] sm:$0xff]  ;;  %v191_v35 = vld [vmem:[%s2747_s1 + $0x170] sm:$0xff]  ;;  %v190_v36 = vld [vmem:[%s2747_s1 + $0x168] sm:$0xff]  ;;  %v106_v53 = vrot.slane %v1952_v27, 7 }
  0x1e   :  { %269 = vmatprep.subr.mxu0 %v148_v47  ;;  %353 = vmatpush1.msra.mxu1 %v217_v59  ;;  %v189_v39 = vld [vmem:[%s2747_s1 + $0x160] sm:$0xff]  ;;  %v188_v40 = vld [vmem:[%s2747_s1 + $0x158] sm:$0xff]  ;;  %v187_v41 = vld [vmem:[%s2747_s1 + $0x150] sm:$0xff]  ;;  %v104_v59 = vrot.slane %v1885_v2, 7 }
  0x1f   :  { %270 = vmatpush1.msra.mxu0 %v147_v49  ;;  %354 = vmatprep.subr.mxu1 %v216_v62  ;;  %v129_v37 = vsel %vm128_vm0, %v126_v23, %v127_v31  ;;  %v186_v42 = vld [vmem:[%s2747_s1 + $0x148] sm:$0xff]  ;;  %v132_v44 = vsel %vm128_vm0, %v127_v31, %v124_v10  ;;  %v185_v45 = vld [vmem:[%s2747_s1 + $0x140] sm:$0xff]  ;;  %v184_v46 = vld [vmem:[%s2747_s1 + $0x138] sm:$0xff] }
  0x20   :  { %271 = vmatprep.subr.mxu0 %v146_v51  ;;  %355 = vmatpush1.msra.mxu1 %v215_v0  ;;  %v183_v47 = vld [vmem:[%s2747_s1 + $0x130] sm:$0xff]  ;;  %v182_v48 = vld [vmem:[%s2747_s1 + $0x128] sm:$0xff]  ;;  %v181_v49 = vld [vmem:[%s2747_s1 + $0x120] sm:$0xff]  ;;  %v51_v51 = vand.u32 15, %v1872_v63  ;;  %v105_v0 = vrot.slane %v1918_v15, 7 }
  0x21   :  { %272 = vmatpush1.msra.mxu0 %v145_v54  ;;  %356 = vmatprep.subr.mxu1 %v214_v5  ;;  %v180_v50 = vld [vmem:[%s2747_s1 + $0x118] sm:$0xff]  ;;  %v179_v54 = vld [vmem:[%s2747_s1 + $0x110] sm:$0xff]  ;;  %v178_v55 = vld [vmem:[%s2747_s1 + $0x108] sm:$0xff] }
  0x22   :  { %273 = vmatprep.subr.mxu0 %v208_v56  ;;  %357 = vmatpush1.msra.mxu1 %v213_v7  ;;  %v177_v56 = vld [vmem:[%s2747_s1 + $0x100] sm:$0xff]  ;;  %vm2038_vm4 = vcmp.ne.s32.totalorder %v51_v51, 0  ;;  %v497_v5 = vld [vmem:[%s2749_s3 + $0xf8] sm:$0xff]  ;;  %v496_v7 = vld [vmem:[%s2749_s3 + $0xf0] sm:$0xff] }
  0x23   :  { %274 = vmatpush2.msra.mxu0 %v207_v58  ;;  %358 = vmatprep.subr.mxu1 %v212_v9  ;;  %v111_v58 = vsel %vm107_vm3, %v106_v53, %v103_v52  ;;  %v495_v9 = vld [vmem:[%s2749_s3 + $0xe8] sm:$0xff]  ;;  %v494_v11 = vld [vmem:[%s2749_s3 + $0xe0] sm:$0xff]  ;;  %v473_v22 = vld [vmem:[%s2749_s3 + $0x38] sm:$0xff] }
  0x24   :  { %275 = vmatprep.subr.mxu0 %v206_v60  ;;  %359 = vmatpush1.msra.mxu1 %v211_v14  ;;  %v45_v60 = vadd.s32 16, %v1872_v63  ;;  %v479_v10 = vld [vmem:[%s2749_s3 + $0x68] sm:$0xff]  ;;  %v478_v12 = vld [vmem:[%s2749_s3 + $0x60] sm:$0xff]  ;;  %v477_v14 = vld [vmem:[%s2749_s3 + $0x58] sm:$0xff] }
  0x25   :  { %276 = vmatpush2.msra.mxu0 %v205_v61  ;;  %360 = vmatprep.subr.mxu1 %v210_v17  ;;  %v110_v61 = vsel %vm107_vm3, %v103_v52, %v104_v59  ;;  %v491_v17 = vld [vmem:[%s2749_s3 + $0xc8] sm:$0xff]  ;;  %v488_v23 = vld [vmem:[%s2749_s3 + $0xb0] sm:$0xff]  ;;  %v469_v31 = vld [vmem:[%s2749_s3 + $0x18] sm:$0xff] }
  0x26   :  { %277 = vmatprep.subr.mxu0 %v204_v4  ;;  %361 = vmatpush1.msra.mxu1 %v209_v19  ;;  %v65_v62 = vand.u32 15, %v45_v60  ;;  %v109_v4 = vsel %vm107_vm3, %v104_v59, %v105_v0  ;;  %v490_v19 = vld [vmem:[%s2749_s3 + $0xc0] sm:$0xff]  ;;  %v484_v32 = vld [vmem:[%s2749_s3 + $0x90] sm:$0xff]  ;;  %v848_v57 = vld [vmem:[%s2751_s2 + $0x268] sm:$0xff] }
  0x27   :  { %278 = vmatpush2.msra.mxu0 %v203_v6  ;;  %395 = vmatmul.mubr.f32.vlgmr.msra.gmra.mxu1 %v131_v21  ;;  %v481_v6 = vld [vmem:[%s2749_s3 + $0x78] sm:$0xff]  ;;  %v1157_v43 = vld [vmem:[%s2754_s5 + $0x60] sm:$0xff] }
  0x28   :  { %279 = vmatprep.subr.mxu0 %v202_v8  ;;  %305 = vmatprep.mubr.f32.mxu0 %v1880_v1  ;;  %vm2053_vm5 = vcmp.ne.s32.totalorder %v65_v62, 0  ;;  %v480_v8 = vld [vmem:[%s2749_s3 + $0x70] sm:$0xff]  ;;  %v489_v21 = vld [vmem:[%s2749_s3 + $0xb8] sm:$0xff]  ;;  %v844_v1 = vld [vmem:[%s2751_s2 + $0x248] sm:$0xff] }
  0x29   :  { %280 = vmatpush2.msra.mxu0 %v201_v13  ;;  %400 = vmatprep.mubr.f32.mxu1 %v1625_v3  ;;  %v493_v13 = vld [vmem:[%s2749_s3 + $0xd8] sm:$0xff] }
  0x2a   :  { %281 = vmatprep.subr.mxu0 %v200_v16  ;;  %1388 = vmatprep.subr.mxu1 %v497_v5  ;;  %v476_v16 = vld [vmem:[%s2749_s3 + $0x50] sm:$0xff] }
  0x2b   :  { %282 = vmatpush2.msra.mxu0 %v199_v18  ;;  %1376 = vmatmul.mubr.msk.f32.gmra.mxu1 %vm1958_vm1, %v130_v30  ;;  %v475_v18 = vld [vmem:[%s2749_s3 + $0x48] sm:$0xff]  ;;  %v485_v30 = vld [vmem:[%s2749_s3 + $0x98] sm:$0xff] }
  0x2c   :  { %283 = vmatprep.subr.mxu0 %v198_v20  ;;  %406 = vmatprep.mubr.f32.mxu1 %v1625_v3  ;;  %v474_v20 = vld [vmem:[%s2749_s3 + $0x40] sm:$0xff] }
  0x2d   :  { %284 = vmatpush2.msra.mxu0 %v197_v24  ;;  %1389 = vmatpush3.msra.mxu1 %v481_v6  ;;  %v472_v24 = vld [vmem:[%s2749_s3 + $0x30] sm:$0xff] }
  0x2e   :  { %285 = vmatprep.subr.mxu0 %v196_v25  ;;  %1390 = vmatprep.subr.mxu1 %v496_v7  ;;  %v487_v25 = vld [vmem:[%s2749_s3 + $0xa8] sm:$0xff] }
  0x2f   :  { %286 = vmatpush2.msra.mxu0 %v195_v26  ;;  %407 = vmatmul.mubr.f32.gmra.mxu1 %v129_v37  ;;  %v471_v26 = vld [vmem:[%s2749_s3 + $0x28] sm:$0xff]  ;;  %v466_v37 = vld [vmem:[%s2749_s3] sm:$0xff] }
  0x30   :  { %287 = vmatprep.subr.mxu0 %v194_v28  ;;  %412 = vmatprep.mubr.f32.mxu1 %v1625_v3  ;;  %v470_v28 = vld [vmem:[%s2749_s3 + $0x20] sm:$0xff] }
  0x31   :  { %288 = vmatpush2.msra.mxu0 %v193_v33  ;;  %1391 = vmatpush3.msra.mxu1 %v480_v8  ;;  %v468_v33 = vld [vmem:[%s2749_s3 + $0x10] sm:$0xff] }
  0x32   :  { %289 = vmatprep.subr.mxu0 %v192_v34  ;;  %1392 = vmatprep.subr.mxu1 %v495_v9  ;;  %v483_v34 = vld [vmem:[%s2749_s3 + $0x88] sm:$0xff] }
  0x33   :  { %290 = vmatpush2.msra.mxu0 %v191_v35  ;;  %1377 = vmatmul.mubr.msk.f32.gmra.mxu1 %vm1997_vm2, %v132_v44  ;;  %v467_v35 = vld [vmem:[%s2749_s3 + $0x8] sm:$0xff] }
  0x34   :  { %291 = vmatprep.subr.mxu0 %v190_v36  ;;  %1393 = vmatpush3.msra.mxu1 %v479_v10  ;;  %v482_v36 = vld [vmem:[%s2749_s3 + $0x80] sm:$0xff] }
  0x35   :  { %292 = vmatpush2.msra.mxu0 %v189_v39  ;;  %1394 = vmatprep.subr.mxu1 %v494_v11 }
  0x36   :  { %293 = vmatprep.subr.mxu0 %v188_v40  ;;  %1395 = vmatpush3.msra.mxu1 %v478_v12 }
  0x37   :  { %294 = vmatpush2.msra.mxu0 %v187_v41  ;;  %1396 = vmatprep.subr.mxu1 %v493_v13 }
  0x38   :  { %295 = vmatprep.subr.mxu0 %v186_v42  ;;  %1397 = vmatpush3.msra.mxu1 %v477_v14 }
  0x39   :  { %296 = vmatpush2.msra.mxu0 %v185_v45 }
  0x3a   :  { %297 = vmatprep.subr.mxu0 %v184_v46 }
  0x3b   :  { %298 = vmatpush2.msra.mxu0 %v183_v47 }
  0x3c   :  { %299 = vmatprep.subr.mxu0 %v182_v48 }
  0x3d   :  { %300 = vmatpush2.msra.mxu0 %v181_v49 }
  0x3e   :  { %301 = vmatprep.subr.mxu0 %v180_v50 }
  0x3f   :  { %302 = vmatpush2.msra.mxu0 %v179_v54 }
  0x40   :  { %303 = vmatprep.subr.mxu0 %v178_v55 }
  0x41   :  { %304 = vmatpush2.msra.mxu0 %v177_v56 }
  0x42   :  { %1374 = vmatmul.mubr.msk.f32.vlgmr.msra.gmra.mxu0 %vm2038_vm4, %v111_v58 }
  0x43   :  { %311 = vmatprep.mubr.f32.mxu0 %v1885_v2  ;;  %v108_v2 = vsel %vm107_vm3, %v105_v0, %v106_v53 }
  0x46   :  { %312 = vmatmul.mubr.f32.gmra.mxu0 %v110_v61 }
  0x47   :  { %317 = vmatprep.mubr.f32.mxu0 %v1918_v15  ;;  %v492_v15 = vld [vmem:[%s2749_s3 + $0xd0] sm:$0xff] }
  0x48   :  { %1398 = vmatprep.subr.mxu1 %v492_v15 }
  0x49   :  { %1399 = vmatpush3.msra.mxu1 %v476_v16 }
  0x4a   :  { %1375 = vmatmul.mubr.msk.f32.gmra.mxu0 %vm2053_vm5, %v109_v4  ;;  %1400 = vmatprep.subr.mxu1 %v491_v17 }
  0x4b   :  { %323 = vmatprep.mubr.f32.mxu0 %v1952_v27  ;;  %1401 = vmatpush3.msra.mxu1 %v475_v18  ;;  %v486_v27 = vld [vmem:[%s2749_s3 + $0xa0] sm:$0xff] }
  0x4c   :  { %1402 = vmatprep.subr.mxu1 %v490_v19 }
  0x4d   :  { %1403 = vmatpush3.msra.mxu1 %v474_v20 }
  0x4e   :  { %324 = vmatmul.mubr.f32.gmra.mxu0 %v108_v2  ;;  %1404 = vmatprep.subr.mxu1 %v489_v21 }
  0x4f   :  { %1405 = vmatpush3.msra.mxu1 %v473_v22 }
  0x50   :  { %1406 = vmatprep.subr.mxu1 %v488_v23 }
  0x51   :  { %1407 = vmatpush3.msra.mxu1 %v472_v24 }
  0x52   :  { %1408 = vmatprep.subr.mxu1 %v487_v25 }
  0x53   :  { %1409 = vmatpush3.msra.mxu1 %v471_v26 }
  0x54   :  { %1410 = vmatprep.subr.mxu1 %v486_v27 }
  0x55   :  { %1411 = vmatpush3.msra.mxu1 %v470_v28 }
  0x56   :  { %1412 = vmatprep.subr.mxu1 %v485_v30 }
  0x57   :  { %1413 = vmatpush3.msra.mxu1 %v469_v31 }
  0x58   :  { %1414 = vmatprep.subr.mxu1 %v484_v32 }
  0x59   :  { %1415 = vmatpush3.msra.mxu1 %v468_v33 }
  0x5a   :  { %1416 = vmatprep.subr.mxu1 %v483_v34 }
  0x5b   :  { %1417 = vmatpush3.msra.mxu1 %v467_v35 }
  0x5c   :  { %1418 = vmatprep.subr.mxu1 %v482_v36 }
  0x5d   :  { %1419 = vmatpush3.msra.mxu1 %v466_v37 }
  0xe7   :  { %v396_v38 = vpop.f32.mrf.mxu1 }
  0xe9   :  { %v398_v39 = vpop.f32.mrf.mxu1 }
  0xeb   :  { %v402_v40 = vpop.f32.mrf.mxu1 }
  0xed   :  { %v404_v41 = vpop.f32.mrf.mxu1 }
  0xef   :  { %v408_v45 = vpop.f32.mrf.mxu1 }
  0xf1   :  { %v410_v50 = vpop.f32.mrf.mxu1 }
  0xf3   :  { %v414_v60 = vpop.f32.mrf.mxu1 }
  0xf5   :  { %v416_v12 = vpop.f32.mrf.mxu1 }
 0x102   :  { %v307_v42 = vpop.f32.mrf.mxu0 }
 0x103   :  { %v2162_v48 = vadd.f32 %v396_v38, %v307_v42 }
 0x104   :  { %v309_v44 = vpop.f32.mrf.mxu0 }
 0x105   :  { %v2166_v52 = vadd.f32 %v398_v39, %v309_v44  ;;  %v437_v56 = vmul.f32 %v2162_v48, %v2162_v48 }
 0x106   :  { %v313_v46 = vpop.f32.mrf.mxu0 }
 0x107   :  { %v2160_v47 = vadd.f32 %v402_v40, %v313_v46  ;;  %v438_v4 = vmul.f32 %v2166_v52, %v2166_v52 }
 0x108   :  { %v315_v49 = vpop.f32.mrf.mxu0 }
 0x109   :  { %v2164_v51 = vadd.f32 %v404_v41, %v315_v49  ;;  %v439_v53 = vmul.f32 %v2160_v47, %v2160_v47  ;;  %v419_v61 = vadd.f32 %v2160_v47, %v2162_v48 }
 0x10a   :  { %v319_v54 = vpop.f32.mrf.mxu0 }
 0x10b   :  { %v2170_v55 = vadd.f32 %v408_v45, %v319_v54  ;;  %v440_v58 = vmul.f32 %v2164_v51, %v2164_v51  ;;  %v445_v2 = vadd.f32 %v439_v53, %v437_v56  ;;  %v428_v6 = vadd.f32 %v2164_v51, %v2166_v52  ;;  %v607_v56 = vld [vmem:[%s2750_s4 + $0x18] sm:$0xff] }
 0x10c   :  { %v321_v59 = vpop.f32.mrf.mxu0  ;;  %640 = vmatprep.subr.mxu1 %v607_v56  ;;  %v816_v56 = vld [vmem:[%s2751_s2 + $0x168] sm:$0xff] }
 0x10d   :  { %v441_v62 = vmul.f32 %v2170_v55, %v2170_v55  ;;  %v2180_v0 = vadd.f32 %v410_v50, %v321_v59  ;;  %v420_v7 = vadd.f32 %v419_v61, %v2170_v55  ;;  %v454_v10 = vadd.f32 %v440_v58, %v438_v4  ;;  %v606_v58 = vld [vmem:[%s2750_s4 + $0x10] sm:$0xff]  ;;  %v605_v59 = vld [vmem:[%s2750_s4 + $0x8] sm:$0xff]  ;;  %v834_v61 = vld [vmem:[%s2751_s2 + $0x1f8] sm:$0xff] }
 0x10e   :  { %v325_v5 = vpop.f32.mrf.mxu0  ;;  %v786_v4 = vld [vmem:[%s2751_s2 + $0x78] sm:$0xff] }
 0x10f   :  { %v442_v8 = vmul.f32 %v2180_v0, %v2180_v0  ;;  %v2189_v9 = vadd.f32 %v414_v60, %v325_v5  ;;  %v446_v11 = vadd.f32 %v445_v2, %v441_v62  ;;  %v429_v14 = vadd.f32 %v428_v6, %v2180_v0  ;;  %v604_v60 = vld [vmem:[%s2750_s4] sm:$0xff]  ;;  %v802_v62 = vld [vmem:[%s2751_s2 + $0xf8] sm:$0xff]  ;;  %v801_v2 = vld [vmem:[%s2751_s2 + $0xf0] sm:$0xff] }
 0x110   :  { %v327_v13 = vpop.f32.mrf.mxu0  ;;  %1423 = vmatprep.subr.mxu0 %v802_v62  ;;  %v785_v5 = vld [vmem:[%s2751_s2 + $0x70] sm:$0xff]  ;;  %v800_v6 = vld [vmem:[%s2751_s2 + $0xe8] sm:$0xff] }
 0x111   :  { %v421_v15 = vadd.f32 %v420_v7, %v2189_v9  ;;  %v443_v16 = vmul.f32 %v2189_v9, %v2189_v9  ;;  %v2195_v17 = vadd.f32 %v416_v12, %v327_v13  ;;  %v455_v18 = vadd.f32 %v454_v10, %v442_v8  ;;  %1424 = vmatpush3.msra.mxu0 %v786_v4  ;;  %v784_v7 = vld [vmem:[%s2751_s2 + $0x68] sm:$0xff]  ;;  %v799_v8 = vld [vmem:[%s2751_s2 + $0xe0] sm:$0xff]  ;;  %v782_v12 = vld [vmem:[%s2751_s2 + $0x58] sm:$0xff] }
 0x112   :  { %1425 = vmatprep.subr.mxu0 %v801_v2  ;;  %v783_v10 = vld [vmem:[%s2751_s2 + $0x60] sm:$0xff]  ;;  %v797_v13 = vld [vmem:[%s2751_s2 + $0xd0] sm:$0xff]  ;;  %v828_v2 = vld [vmem:[%s2751_s2 + $0x1c8] sm:$0xff] }
 0x113   :  { %v422_v19 = vrot.slane %v421_v15, 4  ;;  %v447_v20 = vadd.f32 %v446_v11, %v443_v16  ;;  %v430_v21 = vadd.f32 %v429_v14, %v2195_v17  ;;  %v444_v22 = vmul.f32 %v2195_v17, %v2195_v17  ;;  %1426 = vmatpush3.msra.mxu0 %v785_v5  ;;  %v798_v11 = vld [vmem:[%s2751_s2 + $0xd8] sm:$0xff]  ;;  %v781_v14 = vld [vmem:[%s2751_s2 + $0x50] sm:$0xff]  ;;  %v780_v16 = vld [vmem:[%s2751_s2 + $0x48] sm:$0xff] }
 0x114   :  { %1427 = vmatprep.subr.mxu0 %v800_v6  ;;  %v829_v62 = vld [vmem:[%s2751_s2 + $0x1d0] sm:$0xff]  ;;  %v812_v5 = vld [vmem:[%s2751_s2 + $0x148] sm:$0xff]  ;;  %v827_v6 = vld [vmem:[%s2751_s2 + $0x1c0] sm:$0xff] }
 0x115   :  { %v423_v23 = vadd.f32 %v422_v19, %v421_v15  ;;  %v448_v24 = vrot.slane %v447_v20, 4  ;;  %v431_v25 = vrot.slane %v430_v21, 4  ;;  %v456_v26 = vadd.f32 %v455_v18, %v444_v22  ;;  %1428 = vmatpush3.msra.mxu0 %v784_v7  ;;  %v796_v15 = vld [vmem:[%s2751_s2 + $0xc8] sm:$0xff]  ;;  %v795_v18 = vld [vmem:[%s2751_s2 + $0xc0] sm:$0xff]  ;;  %v813_v4 = vld [vmem:[%s2751_s2 + $0x150] sm:$0xff] }
 0x116   :  { %1429 = vmatprep.subr.mxu0 %v799_v8  ;;  %v779_v19 = vld [vmem:[%s2751_s2 + $0x40] sm:$0xff]  ;;  %v826_v8 = vld [vmem:[%s2751_s2 + $0x1b8] sm:$0xff] }
 0x117   :  { %v424_v27 = vrot.slane %v423_v23, 2  ;;  %v449_v28 = vadd.f32 %v448_v24, %v447_v20  ;;  %v432_v30 = vadd.f32 %v431_v25, %v430_v21  ;;  %v457_v31 = vrot.slane %v456_v26, 4  ;;  %1430 = vmatpush3.msra.mxu0 %v783_v10  ;;  %v794_v20 = vld [vmem:[%s2751_s2 + $0xb8] sm:$0xff]  ;;  %v811_v7 = vld [vmem:[%s2751_s2 + $0x140] sm:$0xff] }
 0x118   :  { %1431 = vmatprep.subr.mxu0 %v798_v11  ;;  %v778_v21 = vld [vmem:[%s2751_s2 + $0x38] sm:$0xff]  ;;  %v825_v11 = vld [vmem:[%s2751_s2 + $0x1b0] sm:$0xff] }
 0x119   :  { %v450_v32 = vrot.slane %v449_v28, 2  ;;  %v433_v33 = vrot.slane %v432_v30, 2  ;;  %v458_v34 = vadd.f32 %v457_v31, %v456_v26  ;;  %v425_v35 = vadd.f32 %v424_v27, %v423_v23  ;;  %1432 = vmatpush3.msra.mxu0 %v782_v12  ;;  %v810_v10 = vld [vmem:[%s2751_s2 + $0x138] sm:$0xff]  ;;  %v809_v12 = vld [vmem:[%s2751_s2 + $0x130] sm:$0xff] }
 0x11a   :  { %1433 = vmatprep.subr.mxu0 %v797_v13  ;;  %v793_v13 = vld [vmem:[%s2751_s2 + $0xb0] sm:$0xff] }
 0x11b   :  { %v451_v36 = vadd.f32 %v450_v32, %v449_v28  ;;  %v434_v37 = vadd.f32 %v433_v33, %v432_v30  ;;  %v459_v38 = vrot.slane %v458_v34, 2  ;;  %v426_v42 = vrot.slane %v425_v35, 1  ;;  %1434 = vmatpush3.msra.mxu0 %v781_v14  ;;  %v824_v14 = vld [vmem:[%s2751_s2 + $0x1a8] sm:$0xff] }
 0x11c   :  { %1435 = vmatprep.subr.mxu0 %v796_v15  ;;  %v1626_v30 = vmov 1966171168   ;;  %v777_v15 = vld [vmem:[%s2751_s2 + $0x30] sm:$0xff] }
 0x11d   :  { %v435_v39 = vrot.slane %v434_v37, 1  ;;  %v460_v40 = vadd.f32 %v459_v38, %v458_v34  ;;  %v452_v41 = vrot.slane %v451_v36, 1  ;;  %v427_v50 = vadd.f32 %v426_v42, %v425_v35  ;;  %1436 = vmatpush3.msra.mxu0 %v780_v16  ;;  %v808_v16 = vld [vmem:[%s2751_s2 + $0x128] sm:$0xff] }
 0x11e   :  { %1437 = vmatprep.subr.mxu0 %v795_v18  ;;  %v578_v31 = vunpack.c.l.s4 %v1626_v30  ;;  %v2284_v42 = vsub.s32 0, %v1872_v63  ;;  %v792_v18 = vld [vmem:[%s2751_s2 + $0xa8] sm:$0xff]  ;;  %v805_v30 = vld [vmem:[%s2751_s2 + $0x110] sm:$0xff] }
 0x11f   :  { %v461_v44 = vrot.slane %v460_v40, 1  ;;  %v453_v45 = vadd.f32 %v452_v41, %v451_v36  ;;  %v436_v46 = vadd.f32 %v435_v39, %v434_v37  ;;  %1438 = vmatpush3.msra.mxu0 %v779_v19  ;;  %v573_v37 = vld [vmem:[%s2752_s7] sm:$0x1] }
 0x120   :  { %1439 = vmatprep.subr.mxu0 %v794_v20  ;;  %v579_v32 = vunpack.c.0.s8 %v578_v31  ;;  %v823_v19 = vld [vmem:[%s2751_s2 + $0x1a0] sm:$0xff]  ;;  %v776_v20 = vld [vmem:[%s2751_s2 + $0x28] sm:$0xff]  ;;  %v789_v31 = vld [vmem:[%s2751_s2 + $0x90] sm:$0xff] }
 0x121   :  { %v462_v49 = vadd.f32 %v461_v44, %v460_v40  ;;  %v464_v54 = vsel %vm463_vm6, %v427_v50, %v453_v45  ;;  %1440 = vmatpush3.msra.mxu0 %v778_v21  ;;  %v594_v40 = vld [vmem:[%s2753_s8] sm:$0x1]  ;;  %v833_v50 = vld [vmem:[%s2751_s2 + $0x1f0] sm:$0xff] }
 0x122   :  { %v2273_v33 = vsub.s32 %v579_v32, %v1872_v63  ;;  %1441 = vmatprep.subr.mxu0 %v793_v13  ;;  %v807_v21 = vld [vmem:[%s2751_s2 + $0x120] sm:$0xff]  ;;  %v820_v32 = vld [vmem:[%s2751_s2 + $0x188] sm:$0xff] }
 0x123   :  { %v465_v53 = vsel %vm463_vm6, %v436_v46, %v462_v49  ;;  %v818_v46 = vld [vmem:[%s2751_s2 + $0x178] sm:$0xff]  ;;  %1442 = vmatpush3.msra.mxu0 %v777_v15 }
 0x124   :  { %562 = vmatprep.mubr.f32.mxu1 %v465_v53  ;;  %v817_v53 = vld [vmem:[%s2751_s2 + $0x170] sm:$0xff]  ;;  %1443 = vmatprep.subr.mxu0 %v792_v18 }
 0x125   :  { %563 = vmatmul.mubr.f32.vlgmr.msra.gmra.mxu1 %v464_v54  ;;  %v832_v54 = vld [vmem:[%s2751_s2 + $0x1e8] sm:$0xff]  ;;  %1444 = vmatpush3.msra.mxu0 %v776_v20 }
 0x126   :  { %676 = vmatprep.mubr.f32.mxu1 %v1625_v3  ;;  %641 = vmatpush1.msra.mxu1 %v606_v58  ;;  %v831_v58 = vld [vmem:[%s2751_s2 + $0x1e0] sm:$0xff] }
 0x127   :  { %642 = vmatprep.subr.mxu1 %v605_v59  ;;  %v815_v59 = vld [vmem:[%s2751_s2 + $0x160] sm:$0xff] }
 0x128   :  { %643 = vmatpush1.msra.mxu1 %v604_v60  ;;  %v830_v60 = vld [vmem:[%s2751_s2 + $0x1d8] sm:$0xff] }
 0x129   :  { %1467 = vmatprep.subr.mxu1 %v834_v61  ;;  %v814_v61 = vld [vmem:[%s2751_s2 + $0x158] sm:$0xff] }
 0x1e5   :  { %v1420_v22 = vpop.f32.mrf.mxu1 }
 0x1e7   :  { %v1421_v23 = vpop.f32.mrf.mxu1 }
 0x1e8   :  { %v1422_v24 = vadd.f32 %v1421_v23, %v1420_v22  ;;  %v791_v22 = vld [vmem:[%s2751_s2 + $0xa0] sm:$0xff]  ;;  %v822_v23 = vld [vmem:[%s2751_s2 + $0x198] sm:$0xff] }
 0x1e9   :  { %1445 = vmatprep.subr.mxu0 %v791_v22 }
 0x1ea   :  { %v568_v25 = vmul.f32 %v1422_v24, %v1422_v24 }
 0x1ec   :  { %v570_v26 = vrot.slane %v568_v25, 7  ;;  %v806_v25 = vld [vmem:[%s2751_s2 + $0x118] sm:$0xff] }
 0x1ee   :  { %v572_v27 = vsub.f32 %v1422_v24, %v570_v26  ;;  %v790_v26 = vld [vmem:[%s2751_s2 + $0x98] sm:$0xff] }
 0x1f0   :  { %v574_v28 = vadd.f32 1e-05, %v572_v27  ;;  %v821_v27 = vld [vmem:[%s2751_s2 + $0x190] sm:$0xff] }
 0x1f2   :  { %1617 = vrsqrt.f32 %v574_v28  ;;  %v774_v28 = vld [vmem:[%s2751_s2 + $0x18] sm:$0xff] }
 0x1ff   :  { %v1618_v34 = vpop.eup %1617 }
 0x200   :  { %v583_v35 = vrot.slane %v1618_v34, %v2273_v33  ;;  %v773_v34 = vld [vmem:[%s2751_s2 + $0x10] sm:$0xff] }
 0x202   :  { %v584_v36 = vcombine.high %v583_v35, %v583_v35  ;;  %v804_v35 = vld [vmem:[%s2751_s2 + $0x108] sm:$0xff] }
 0x204   :  { %v591_v38 = vrot.slane %v584_v36, %v2273_v33  ;;  %v788_v36 = vld [vmem:[%s2751_s2 + $0x88] sm:$0xff] }
 0x206   :  { %v593_v39 = vmul.f32 %v591_v38, %v573_v37  ;;  %v819_v37 = vld [vmem:[%s2751_s2 + $0x180] sm:$0xff]  ;;  %v772_v38 = vld [vmem:[%s2751_s2 + $0x8] sm:$0xff] }
 0x208   :  { %v595_v41 = vmul.f32 %v1422_v24, %v593_v39  ;;  %v775_v24 = vld [vmem:[%s2751_s2 + $0x20] sm:$0xff] }
 0x209   :  { %1446 = vmatpush3.msra.mxu0 %v775_v24 }
 0x20a   :  { %v596_v44 = vsub.f32 %v594_v40, %v595_v41  ;;  %1447 = vmatprep.subr.mxu0 %v790_v26  ;;  %v787_v40 = vld [vmem:[%s2751_s2 + $0x80] sm:$0xff] }
 0x20b   :  { %1448 = vmatpush3.msra.mxu0 %v774_v28  ;;  %v771_v41 = vld [vmem:[%s2751_s2] sm:$0xff] }
 0x20c   :  { %v601_v45 = vrot.slane %v596_v44, %v2284_v42  ;;  %1449 = vmatprep.subr.mxu0 %v789_v31  ;;  %v866_v44 = vld [vmem:[%s2751_s2 + $0x2f8] sm:$0xff] }
 0x20d   :  { %1450 = vmatpush3.msra.mxu0 %v773_v34 }
 0x20e   :  { %v603_v49 = vsel %vm463_vm6, %v593_v39, %v601_v45  ;;  %1451 = vmatprep.subr.mxu0 %v788_v36  ;;  %v803_v39 = vld [vmem:[%s2751_s2 + $0x100] sm:$0xff]  ;;  %v2428_v45 = vsub.s32 1, %v1872_v63  ;;  %v1158_v63 = vld [vmem:[%s2754_s5 + $0x68] sm:$0xff] }
 0x20f   :  { %1378 = vmatmul.mubr.msk.f32.vlgmr.msra.gmra.mxu1 %vm608_vm7, %v603_v49  ;;  %1452 = vmatpush3.msra.mxu0 %v772_v38  ;;  %v847_v36 = vld [vmem:[%s2751_s2 + $0x260] sm:$0xff]  ;;  %v846_v38 = vld [vmem:[%s2751_s2 + $0x258] sm:$0xff] }
 0x210   :  { %1468 = vmatpush3.msra.mxu1 %v818_v46  ;;  %1453 = vmatprep.subr.mxu0 %v787_v40  ;;  %v861_v40 = vld [vmem:[%s2751_s2 + $0x2d0] sm:$0xff] }
 0x211   :  { %1469 = vmatprep.subr.mxu1 %v833_v50  ;;  %1454 = vmatpush3.msra.mxu0 %v771_v41 }
 0x212   :  { %1470 = vmatpush3.msra.mxu1 %v817_v53  ;;  %1511 = vmatprep.subr.mxu0 %v866_v44  ;;  %v845_v44 = vld [vmem:[%s2751_s2 + $0x250] sm:$0xff] }
 0x213   :  { %1471 = vmatprep.subr.mxu1 %v832_v54 }
 0x214   :  { %1472 = vmatpush3.msra.mxu1 %v816_v56 }
 0x215   :  { %1473 = vmatprep.subr.mxu1 %v831_v58 }
 0x216   :  { %1474 = vmatpush3.msra.mxu1 %v815_v59 }
 0x217   :  { %1475 = vmatprep.subr.mxu1 %v830_v60 }
 0x218   :  { %1476 = vmatpush3.msra.mxu1 %v814_v61 }
 0x219   :  { %1477 = vmatprep.subr.mxu1 %v829_v62 }
 0x21a   :  { %1478 = vmatpush3.msra.mxu1 %v813_v4 }
 0x21b   :  { %1479 = vmatprep.subr.mxu1 %v828_v2 }
 0x21c   :  { %1480 = vmatpush3.msra.mxu1 %v812_v5 }
 0x21d   :  { %1481 = vmatprep.subr.mxu1 %v827_v6 }
 0x21e   :  { %1482 = vmatpush3.msra.mxu1 %v811_v7 }
 0x21f   :  { %1483 = vmatprep.subr.mxu1 %v826_v8 }
 0x220   :  { %1484 = vmatpush3.msra.mxu1 %v810_v10 }
 0x221   :  { %1485 = vmatprep.subr.mxu1 %v825_v11 }
 0x222   :  { %1486 = vmatpush3.msra.mxu1 %v809_v12 }
 0x223   :  { %1487 = vmatprep.subr.mxu1 %v824_v14 }
 0x224   :  { %1488 = vmatpush3.msra.mxu1 %v808_v16 }
 0x225   :  { %1489 = vmatprep.subr.mxu1 %v823_v19 }
 0x226   :  { %1490 = vmatpush3.msra.mxu1 %v807_v21  ;;  %v850_v21 = vld [vmem:[%s2751_s2 + $0x278] sm:$0xff] }
 0x227   :  { %1491 = vmatprep.subr.mxu1 %v822_v23  ;;  %v865_v23 = vld [vmem:[%s2751_s2 + $0x2f0] sm:$0xff] }
 0x228   :  { %1492 = vmatpush3.msra.mxu1 %v806_v25 }
 0x229   :  { %1493 = vmatprep.subr.mxu1 %v821_v27  ;;  %v849_v27 = vld [vmem:[%s2751_s2 + $0x270] sm:$0xff] }
 0x22a   :  { %1494 = vmatpush3.msra.mxu1 %v805_v30  ;;  %v864_v30 = vld [vmem:[%s2751_s2 + $0x2e8] sm:$0xff] }
 0x22b   :  { %1495 = vmatprep.subr.mxu1 %v820_v32  ;;  %v863_v32 = vld [vmem:[%s2751_s2 + $0x2e0] sm:$0xff] }
 0x22c   :  { %1496 = vmatpush3.msra.mxu1 %v804_v35 }
 0x22d   :  { %1497 = vmatprep.subr.mxu1 %v819_v37  ;;  %v862_v37 = vld [vmem:[%s2751_s2 + $0x2d8] sm:$0xff] }
 0x22e   :  { %1498 = vmatpush3.msra.mxu1 %v803_v39 }
 0x22f   :  { %1574 = vmatprep.subr.mxu1 %v1625_v3 }
 0x2cf   :  { %v678_v46 = vpop.f32.mrf.mxu1 }
 0x2d0   :  { %v686_v49 = vrot.slane %v678_v46, %v2284_v42  ;;  %v702_v56 = vrot.slane %v678_v46, %v2428_v45 }
 0x2d1   :  { %v680_v50 = vpop.f32.mrf.mxu1 }
 0x2d2   :  { %v691_v53 = vmul.f32 %v686_v49, %v2162_v48  ;;  %v697_v54 = vmul.f32 %v686_v49, %v2189_v9  ;;  %v690_v58 = vrot.slane %v680_v50, %v2284_v42  ;;  %v706_v59 = vrot.slane %v680_v50, %v2428_v45  ;;  %v860_v50 = vld [vmem:[%s2751_s2 + $0x2c8] sm:$0xff] }
 0x2d3   :  { %v693_v60 = vmul.f32 %v686_v49, %v2160_v47  ;;  %v695_v61 = vmul.f32 %v686_v49, %v2170_v55 }
 0x2d4   :  { %v713_v62 = vadd.f32 %v702_v56, %v697_v54  ;;  %v698_v4 = vmul.f32 %v690_v58, %v2195_v17  ;;  %v692_v2 = vmul.f32 %v690_v58, %v2166_v52  ;;  %v707_v5 = vadd.f32 %v702_v56, %v691_v53  ;;  %v859_v54 = vld [vmem:[%s2751_s2 + $0x2c0] sm:$0xff] }
 0x2d5   :  { %v694_v48 = vmul.f32 %v690_v58, %v2164_v51  ;;  %v709_v6 = vadd.f32 %v702_v56, %v693_v60  ;;  %v696_v9 = vmul.f32 %v690_v58, %v2180_v0  ;;  %v711_v17 = vadd.f32 %v702_v56, %v695_v61  ;;  %v843_v58 = vld [vmem:[%s2751_s2 + $0x240] sm:$0xff]  ;;  %v842_v60 = vld [vmem:[%s2751_s2 + $0x238] sm:$0xff]  ;;  %v857_v61 = vld [vmem:[%s2751_s2 + $0x2b0] sm:$0xff] }
 0x2d6   :  { %v2442_v7 = vmax.f32 %v713_v62, 0.0  ;;  %v714_v8 = vadd.f32 %v706_v59, %v698_v4  ;;  %v708_v10 = vadd.f32 %v706_v59, %v692_v2  ;;  %v2444_v11 = vmax.f32 %v707_v5, 0.0  ;;  %v841_v62 = vld [vmem:[%s2751_s2 + $0x230] sm:$0xff]  ;;  %v856_v4 = vld [vmem:[%s2751_s2 + $0x2a8] sm:$0xff]  ;;  %v855_v5 = vld [vmem:[%s2751_s2 + $0x2a0] sm:$0xff] }
 0x2d7   :  { %v710_v47 = vadd.f32 %v706_v59, %v694_v48  ;;  %v712_v12 = vadd.f32 %v706_v59, %v696_v9  ;;  %v2454_v0 = vmax.f32 %v709_v6, 0.0  ;;  %v2477_v25 = vmax.f32 %v711_v17, 0.0  ;;  %v858_v59 = vld [vmem:[%s2751_s2 + $0x2b8] sm:$0xff]  ;;  %v840_v2 = vld [vmem:[%s2751_s2 + $0x228] sm:$0xff]  ;;  %v839_v48 = vld [vmem:[%s2751_s2 + $0x220] sm:$0xff] }
 0x2d8   :  { %v2446_v55 = vmax.f32 %v714_v8, 0.0  ;;  %v2448_v13 = vmax.f32 %v708_v10, 0.0  ;;  %v723_v52 = vrot.slane %v2444_v11, 7  ;;  %v729_v51 = vrot.slane %v2442_v7, 7  ;;  %v854_v6 = vld [vmem:[%s2751_s2 + $0x298] sm:$0xff]  ;;  %v853_v8 = vld [vmem:[%s2751_s2 + $0x290] sm:$0xff] }
 0x2d9   :  { %v2451_v14 = vmax.f32 %v710_v47, 0.0  ;;  %v2459_v18 = vmax.f32 %v712_v12, 0.0  ;;  %v725_v24 = vrot.slane %v2454_v0, 7  ;;  %v727_v34 = vrot.slane %v2477_v25, 7  ;;  %v838_v9 = vld [vmem:[%s2751_s2 + $0x218] sm:$0xff]  ;;  %v837_v10 = vld [vmem:[%s2751_s2 + $0x210] sm:$0xff] }
 0x2da   :  { %1016 = vmatprep.mubr.f32.mxu1 %v2448_v13  ;;  %v724_v15 = vrot.slane %v2448_v13, 7  ;;  %v730_v16 = vrot.slane %v2446_v55, 7  ;;  %v737_v22 = vsel %vm107_vm3, %v729_v51, %v723_v52  ;;  %v748_v46 = vrot.slane %v2448_v13, 1  ;;  %v852_v47 = vld [vmem:[%s2751_s2 + $0x288] sm:$0xff]  ;;  %v1159_v13 = vld [vmem:[%s2754_s5 + $0x70] sm:$0xff] }
 0x2db   :  { %1017 = vmatmul.mubr.f32.vlgmr.msra.gmra.mxu1 %v2444_v11  ;;  %v726_v19 = vrot.slane %v2451_v14, 7  ;;  %v728_v28 = vrot.slane %v2459_v18, 7  ;;  %v735_v31 = vsel %vm107_vm3, %v723_v52, %v725_v24  ;;  %v733_v39 = vsel %vm107_vm3, %v725_v24, %v727_v34  ;;  %v836_v12 = vld [vmem:[%s2751_s2 + $0x208] sm:$0xff]  ;;  %v851_v52 = vld [vmem:[%s2751_s2 + $0x280] sm:$0xff]  ;;  %v1155_v24 = vld [vmem:[%s2754_s5 + $0x50] sm:$0xff] }
 0x2dc   :  { %1021 = vmatprep.mubr.f32.mxu1 %v2451_v14  ;;  %v738_v20 = vsel %vm107_vm3, %v730_v16, %v724_v15  ;;  %v750_v49 = vrot.slane %v2451_v14, 1  ;;  %v731_v53 = vsel %vm107_vm3, %v727_v34, %v729_v51  ;;  %v749_v17 = vrot.slane %v2454_v0, 1  ;;  %v835_v51 = vld [vmem:[%s2751_s2 + $0x200] sm:$0xff]  ;;  %v1146_v34 = vld [vmem:[%s2754_s5 + $0x8] sm:$0xff] }
 0x2dd   :  { %1379 = vmatprep.mubr.msk.f32.mxu0 %vm2038_vm4, %v738_v20  ;;  %v736_v26 = vsel %vm107_vm3, %v724_v15, %v726_v19  ;;  %v734_v35 = vsel %vm107_vm3, %v726_v19, %v728_v28  ;;  %v732_v41 = vsel %vm107_vm3, %v728_v28, %v730_v16  ;;  %v747_v14 = vrot.slane %v2444_v11, 1  ;;  %v1151_v28 = vld [vmem:[%s2754_s5 + $0x30] sm:$0xff] }
 0x2de   :  { %1380 = vmatmul.mubr.msk.f32.vlgmr.msra.gmra.mxu0 %vm2038_vm4, %v737_v22  ;;  %v760_v56 = vsel %vm128_vm0, %v748_v46, %v750_v49  ;;  %v752_v15 = vrot.slane %v2459_v18, 1  ;;  %v751_v16 = vrot.slane %v2477_v25, 1  ;;  %v754_v11 = vrot.slane %v2446_v55, 1 }
 0x2df   :  { %1512 = vmatpush3.msra.mxu0 %v850_v21  ;;  %936 = vmatprep.mubr.f32.mxu0 %v736_v26  ;;  %v753_v20 = vrot.slane %v2442_v7, 1  ;;  %v1153_v26 = vld [vmem:[%s2754_s5 + $0x40] sm:$0xff] }
 0x2e0   :  { %1022 = vmatmul.mubr.f32.gmra.mxu1 %v2454_v0  ;;  %1513 = vmatprep.subr.mxu0 %v865_v23  ;;  %v759_v0 = vsel %vm128_vm0, %v747_v14, %v749_v17  ;;  %v758_v19 = vsel %vm128_vm0, %v750_v49, %v752_v15  ;;  %v756_v21 = vsel %vm128_vm0, %v752_v15, %v754_v11  ;;  %v1156_v23 = vld [vmem:[%s2754_s5 + $0x58] sm:$0xff] }
 0x2e1   :  { %1026 = vmatprep.mubr.f32.mxu1 %v2459_v18  ;;  %1514 = vmatpush3.msra.mxu0 %v849_v27  ;;  %v757_v18 = vsel %vm128_vm0, %v749_v17, %v751_v16  ;;  %v755_v22 = vsel %vm128_vm0, %v751_v16, %v753_v20  ;;  %v761_v29 = vsel %vm128_vm0, %v753_v20, %v747_v14  ;;  %v1152_v27 = vld [vmem:[%s2754_s5 + $0x38] sm:$0xff] }
 0x2e2   :  { %1515 = vmatprep.subr.mxu0 %v864_v30  ;;  %937 = vmatmul.mubr.f32.gmra.mxu0 %v735_v31  ;;  %v1150_v30 = vld [vmem:[%s2754_s5 + $0x28] sm:$0xff]  ;;  %v1148_v31 = vld [vmem:[%s2754_s5 + $0x18] sm:$0xff] }
 0x2e3   :  { %1516 = vmatpush3.msra.mxu0 %v848_v57  ;;  %1381 = vmatprep.mubr.msk.f32.mxu0 %vm2053_vm5, %v734_v35  ;;  %v1149_v57 = vld [vmem:[%s2754_s5 + $0x20] sm:$0xff] }
 0x2e4   :  { %1027 = vmatmul.mubr.f32.gmra.mxu1 %v2477_v25  ;;  %1517 = vmatprep.subr.mxu0 %v863_v32  ;;  %v1154_v25 = vld [vmem:[%s2754_s5 + $0x48] sm:$0xff]  ;;  %v1147_v32 = vld [vmem:[%s2754_s5 + $0x10] sm:$0xff]  ;;  %v1145_v35 = vld [vmem:[%s2754_s5] sm:$0xff] }
 0x2e5   :  { %1031 = vmatprep.mubr.f32.mxu1 %v2446_v55  ;;  %1518 = vmatpush3.msra.mxu0 %v847_v36  ;;  %v762_v55 = vsel %vm128_vm0, %v754_v11, %v748_v46 }
 0x2e6   :  { %1519 = vmatprep.subr.mxu0 %v862_v37  ;;  %1382 = vmatmul.mubr.msk.f32.gmra.mxu0 %vm2053_vm5, %v733_v39 }
 0x2e7   :  { %1520 = vmatpush3.msra.mxu0 %v846_v38  ;;  %946 = vmatprep.mubr.f32.mxu0 %v732_v41 }
 0x2e8   :  { %1032 = vmatmul.mubr.f32.gmra.mxu1 %v2442_v7  ;;  %1521 = vmatprep.subr.mxu0 %v861_v40  ;;  %v1160_v7 = vld [vmem:[%s2754_s5 + $0x78] sm:$0xff] }
 0x2e9   :  { %1522 = vmatpush3.msra.mxu0 %v845_v44  ;;  %1575 = vmatpush3.msra.mxu1 %v1160_v7 }
 0x2ea   :  { %1523 = vmatprep.subr.mxu0 %v860_v50  ;;  %947 = vmatmul.mubr.f32.gmra.mxu0 %v731_v53 }
 0x2eb   :  { %1524 = vmatpush3.msra.mxu0 %v844_v1  ;;  %1101 = vmatprep.mubr.f32.mxu0 %v760_v56 }
 0x2ec   :  { %1525 = vmatprep.subr.mxu0 %v859_v54  ;;  %1576 = vmatprep.subr.mxu1 %v1625_v3 }
 0x2ed   :  { %1526 = vmatpush3.msra.mxu0 %v843_v58  ;;  %1577 = vmatpush3.msra.mxu1 %v1159_v13 }
 0x2ee   :  { %1527 = vmatprep.subr.mxu0 %v858_v59  ;;  %1578 = vmatprep.subr.mxu1 %v1625_v3 }
 0x2ef   :  { %1528 = vmatpush3.msra.mxu0 %v842_v60  ;;  %1579 = vmatpush3.msra.mxu1 %v1158_v63 }
 0x2f0   :  { %1529 = vmatprep.subr.mxu0 %v857_v61  ;;  %1580 = vmatprep.subr.mxu1 %v1625_v3 }
 0x2f1   :  { %1530 = vmatpush3.msra.mxu0 %v841_v62  ;;  %1581 = vmatpush3.msra.mxu1 %v1157_v43 }
 0x2f2   :  { %1531 = vmatprep.subr.mxu0 %v856_v4  ;;  %1582 = vmatprep.subr.mxu1 %v1625_v3 }
 0x2f3   :  { %1532 = vmatpush3.msra.mxu0 %v840_v2  ;;  %1583 = vmatpush3.msra.mxu1 %v1156_v23 }
 0x2f4   :  { %1533 = vmatprep.subr.mxu0 %v855_v5  ;;  %1584 = vmatprep.subr.mxu1 %v1625_v3 }
 0x2f5   :  { %1534 = vmatpush3.msra.mxu0 %v839_v48  ;;  %1585 = vmatpush3.msra.mxu1 %v1155_v24 }
 0x2f6   :  { %1535 = vmatprep.subr.mxu0 %v854_v6  ;;  %1586 = vmatprep.subr.mxu1 %v1625_v3 }
 0x2f7   :  { %1536 = vmatpush3.msra.mxu0 %v838_v9  ;;  %1587 = vmatpush3.msra.mxu1 %v1154_v25 }
 0x2f8   :  { %1537 = vmatprep.subr.mxu0 %v853_v8  ;;  %1588 = vmatprep.subr.mxu1 %v1625_v3 }
 0x2f9   :  { %1538 = vmatpush3.msra.mxu0 %v837_v10  ;;  %1589 = vmatpush3.msra.mxu1 %v1153_v26 }
 0x2fa   :  { %1539 = vmatprep.subr.mxu0 %v852_v47  ;;  %1590 = vmatprep.subr.mxu1 %v1625_v3 }
 0x2fb   :  { %1540 = vmatpush3.msra.mxu0 %v836_v12  ;;  %1591 = vmatpush3.msra.mxu1 %v1152_v27 }
 0x2fc   :  { %1541 = vmatprep.subr.mxu0 %v851_v52  ;;  %1592 = vmatprep.subr.mxu1 %v1625_v3 }
 0x2fd   :  { %1542 = vmatpush3.msra.mxu0 %v835_v51  ;;  %1606 = vmatprep.mubr.msk.f32.mxu1 %vm1627_vm8, %v1625_v3 }
 0x2fe   :  { %1102 = vmatmul.mubr.f32.vlgmr.msra.gmra.mxu0 %v759_v0  ;;  %1593 = vmatpush3.msra.mxu1 %v1151_v28 }
 0x2ff   :  { %1383 = vmatprep.mubr.msk.f32.mxu0 %vm1958_vm1, %v758_v19  ;;  %1594 = vmatprep.subr.mxu1 %v1625_v3 }
 0x300   :  { %1595 = vmatpush3.msra.mxu1 %v1150_v30 }
 0x301   :  { %1596 = vmatprep.subr.mxu1 %v1625_v3 }
 0x302   :  { %1384 = vmatmul.mubr.msk.f32.gmra.mxu0 %vm1958_vm1, %v757_v18  ;;  %1597 = vmatpush3.msra.mxu1 %v1149_v57 }
 0x303   :  { %1111 = vmatprep.mubr.f32.mxu0 %v756_v21  ;;  %1598 = vmatprep.subr.mxu1 %v1625_v3 }
 0x304   :  { %1599 = vmatpush3.msra.mxu1 %v1148_v31 }
 0x305   :  { %1600 = vmatprep.subr.mxu1 %v1625_v3 }
 0x306   :  { %1112 = vmatmul.mubr.f32.gmra.mxu0 %v755_v22  ;;  %1601 = vmatpush3.msra.mxu1 %v1147_v32 }
 0x307   :  { %1385 = vmatprep.mubr.msk.f32.mxu0 %vm1997_vm2, %v762_v55  ;;  %1602 = vmatprep.subr.mxu1 %v1625_v3 }
 0x308   :  { %1603 = vmatpush3.msra.mxu1 %v1146_v34 }
 0x309   :  { %1604 = vmatprep.subr.mxu1 %v1625_v3 }
 0x30a   :  { %1386 = vmatmul.mubr.msk.f32.gmra.mxu0 %vm1997_vm2, %v761_v29  ;;  %1605 = vmatpush3.msra.mxu1 %v1145_v35 }
 0x30b   :  { %1609 = vmatprep.subr.mxu1 %v1625_v3 }
 0x39b   :  { %v1499_v39 = vpop.f32.mrf.mxu1 }
 0x39d   :  { %v1500_v41 = vpop.f32.mrf.mxu1 }
 0x39e   :  { %v1455_v36 = vpop.f32.mrf.mxu0  ;;  %v1501_v5 = vadd.f32 %v1500_v41, %v1499_v39 }
 0x3a0   :  { %v1456_v37 = vpop.f32.mrf.mxu0  ;;  %v1502_v46 = vpop.f32.mrf.mxu1 }
 0x3a1   :  { %v1457_v62 = vadd.f32 %v1456_v37, %v1455_v36 }
 0x3a2   :  { %v1458_v38 = vpop.f32.mrf.mxu0  ;;  %v1503_v50 = vpop.f32.mrf.mxu1 }
 0x3a3   :  { %v1504_v4 = vadd.f32 %v1503_v50, %v1502_v46  ;;  %v1019_v12 = vadd.f32 %v1501_v5, %v1457_v62  ;;  %v1267_v46 = vld [vmem:[%s2755_s6] sm:$0xff] }
 0x3a4   :  { %v1459_v40 = vpop.f32.mrf.mxu0  ;;  %v1505_v53 = vpop.f32.mrf.mxu1 }
 0x3a5   :  { %v1460_v60 = vadd.f32 %v1459_v40, %v1458_v38 }
 0x3a6   :  { %v1461_v44 = vpop.f32.mrf.mxu0  ;;  %v1506_v58 = vpop.f32.mrf.mxu1 }
 0x3a7   :  { %v1024_v6 = vadd.f32 %v1504_v4, %v1460_v60  ;;  %v1507_v17 = vadd.f32 %v1506_v58, %v1505_v53  ;;  %v1257_v4 = vld [vmem:[%s2757_s10] sm:$0x1] }
 0x3a8   :  { %v1462_v49 = vpop.f32.mrf.mxu0  ;;  %v1508_v2 = vpop.f32.mrf.mxu1 }
 0x3a9   :  { %v1463_v9 = vadd.f32 %v1462_v49, %v1461_v44 }
 0x3aa   :  { %v1464_v1 = vpop.f32.mrf.mxu0  ;;  %v1509_v52 = vpop.f32.mrf.mxu1 }
 0x3ab   :  { %v1029_v0 = vadd.f32 %v1507_v17, %v1463_v9  ;;  %v1510_v11 = vadd.f32 %v1509_v52, %v1508_v2 }
 0x3ac   :  { %v1465_v54 = vpop.f32.mrf.mxu0 }
 0x3ad   :  { %v1466_v51 = vadd.f32 %v1465_v54, %v1464_v1 }
 0x3af   :  { %v1034_v22 = vadd.f32 %v1510_v11, %v1466_v51  ;;  %v1621_v11 = vld [vmem:[%s2748_s0] sm:$0xff] }
 0x3be   :  { %v1543_v56 = vpop.f32.mrf.mxu0 }
 0x3c0   :  { %v1544_v59 = vpop.f32.mrf.mxu0 }
 0x3c1   :  { %v1545_v8 = vadd.f32 %v1544_v59, %v1543_v56 }
 0x3c2   :  { %v1546_v61 = vpop.f32.mrf.mxu0 }
 0x3c3   :  { %v2695_v16 = vadd.f32 %v1545_v8, %v1019_v12 }
 0x3c4   :  { %v1547_v48 = vpop.f32.mrf.mxu0 }
 0x3c5   :  { %v1548_v10 = vadd.f32 %v1547_v48, %v1546_v61  ;;  %v1131_v29 = vmul.f32 %v2695_v16, %v2695_v16 }
 0x3c6   :  { %v1549_v47 = vpop.f32.mrf.mxu0 }
 0x3c7   :  { %v2693_v14 = vadd.f32 %v1548_v10, %v1024_v6 }
 0x3c8   :  { %v1550_v15 = vpop.f32.mrf.mxu0 }
 0x3c9   :  { %v1551_v19 = vadd.f32 %v1550_v15, %v1549_v47  ;;  %v1132_v20 = vmul.f32 %v2693_v14, %v2693_v14  ;;  %v1122_v7 = vadd.f32 %v2693_v14, %v2695_v16 }
 0x3ca   :  { %v1552_v18 = vpop.f32.mrf.mxu0 }
 0x3cb   :  { %v1114_v21 = vadd.f32 %v1551_v19, %v1029_v0  ;;  %v1135_v43 = vadd.f32 %v1132_v20, %v1131_v29  ;;  %v1624_v20 = vld [vmem:[%s2748_s0 + $0x18] sm:$0xff] }
 0x3cc   :  { %v1553_v55 = vpop.f32.mrf.mxu0 }
 0x3cd   :  { %v1133_v13 = vmul.f32 %v1114_v21, %v1114_v21  ;;  %v1554_v63 = vadd.f32 %v1553_v55, %v1552_v18  ;;  %v1123_v23 = vadd.f32 %v1122_v7, %v1114_v21 }
 0x3cf   :  { %v1119_v24 = vadd.f32 %v1554_v63, %v1034_v22  ;;  %v1136_v25 = vadd.f32 %v1135_v43, %v1133_v13 }
 0x3d1   :  { %v1124_v26 = vadd.f32 %v1123_v23, %v1119_v24  ;;  %v1134_v27 = vmul.f32 %v1119_v24, %v1119_v24 }
 0x3d3   :  { %v1125_v28 = vrot.slane %v1124_v26, 4  ;;  %v1137_v30 = vadd.f32 %v1136_v25, %v1134_v27 }
 0x3d5   :  { %v1126_v57 = vadd.f32 %v1125_v28, %v1124_v26  ;;  %v1138_v31 = vrot.slane %v1137_v30, 4 }
 0x3d7   :  { %v1127_v32 = vrot.slane %v1126_v57, 2  ;;  %v1139_v34 = vadd.f32 %v1138_v31, %v1137_v30 }
 0x3d9   :  { %v1128_v35 = vadd.f32 %v1127_v32, %v1126_v57  ;;  %v1140_v36 = vrot.slane %v1139_v34, 2 }
 0x3db   :  { %v1129_v37 = vrot.slane %v1128_v35, 1  ;;  %v1141_v38 = vadd.f32 %v1140_v36, %v1139_v34 }
 0x3dd   :  { %v1142_v39 = vrot.slane %v1141_v38, 1  ;;  %v1130_v40 = vadd.f32 %v1129_v37, %v1128_v35 }
 0x3df   :  { %v1143_v41 = vadd.f32 %v1142_v39, %v1141_v38 }
 0x3e1   :  { %v1144_v44 = vsel %vm463_vm6, %v1130_v40, %v1143_v41 }
 0x3e2   :  { %1607 = vmatmul.mubr.f32.vlgmr.msra.gmra.mxu1 %v1144_v44 }
 0x3e3   :  { %1611 = vmatprep.mubr.msk.f32.mxu1 %vm1627_vm8, %v1625_v3  ;;  %1610 = vmatpush3.msra.mxu1 %v1267_v46  ;;  %v1236_v3 = vld [vmem:[%s2756_s9] sm:$0x1] }
 0x4a2   :  { %v1227_v49 = vpop.f32.mrf.mxu1 }
 0x4a3   :  { %v1231_v50 = vmul.f32 %v1227_v49, %v1227_v49 }
 0x4a4   :  { %v1608_v1 = vpop.f32.mrf.mxu1 }
 0x4a5   :  { %v1233_v53 = vrot.slane %v1231_v50, 7 }
 0x4a7   :  { %v1235_v54 = vsub.f32 %v1227_v49, %v1233_v53 }
 0x4a9   :  { %v1237_v56 = vadd.f32 1e-05, %v1235_v54 }
 0x4ab   :  { %1619 = vrsqrt.f32 %v1237_v56 }
 0x4b8   :  { %v1620_v58 = vpop.eup %1619 }
 0x4b9   :  { %v1246_v59 = vrot.slane %v1620_v58, %v2273_v33 }
 0x4bb   :  { %v1247_v60 = vcombine.high %v1246_v59, %v1246_v59 }
 0x4bd   :  { %v1254_v61 = vrot.slane %v1247_v60, %v2273_v33 }
 0x4bf   :  { %v1256_v62 = vmul.f32 %v1254_v61, %v1236_v3 }
 0x4c1   :  { %v1258_v2 = vmul.f32 %v1256_v62, %v1227_v49 }
 0x4c3   :  { %v1259_v5 = vsub.f32 %v1257_v4, %v1258_v2 }
 0x4c5   :  { %v1264_v48 = vrot.slane %v1259_v5, %v2284_v42 }
 0x4c7   :  { %v1266_v6 = vsel %vm463_vm6, %v1256_v62, %v1264_v48 }
 0x4c8   :  { %1612 = vmatmul.mubr.msk.f32.vlgmr.msra.gmra.mxu1 %vm1268_vm9, %v1266_v6 }
 0x588   :  { %v1338_v9 = vpop.f32.mrf.mxu1 }
 0x589   :  { %v1345_v8 = vrot.slane %v1338_v9, %v2284_v42  ;;  %v1353_v10 = vrot.slane %v1338_v9, %v2428_v45  ;;  %v1622_v42 = vld [vmem:[%s2748_s0 + $0x8] sm:$0xff] }
 0x58a   :  { %v1613_v47 = vpop.f32.mrf.mxu1 }
 0x58b   :  { %v1346_v33 = vmul.f32 %v1345_v8, %v2695_v16  ;;  %v1347_v12 = vmul.f32 %v1345_v8, %v2693_v14  ;;  %v1348_v17 = vmul.f32 %v1345_v8, %v1114_v21  ;;  %v1349_v52 = vmul.f32 %v1345_v8, %v1119_v24  ;;  %v1623_v14 = vld [vmem:[%s2748_s0 + $0x10] sm:$0xff] }
 0x58d   :  { %v1354_v51 = vadd.f32 %v1353_v10, %v1346_v33  ;;  %v1355_v15 = vadd.f32 %v1353_v10, %v1347_v12  ;;  %v1356_v0 = vadd.f32 %v1353_v10, %v1348_v17  ;;  %v1357_v19 = vadd.f32 %v1353_v10, %v1349_v52 }
 0x58f   :  { %v1358_v18 = vadd.f32 %v1621_v11, %v1354_v51  ;;  %v1359_v45 = vadd.f32 %v1622_v42, %v1355_v15  ;;  %v1360_v16 = vadd.f32 %v1623_v14, %v1356_v0  ;;  %v1361_v21 = vadd.f32 %v1624_v20, %v1357_v19 }
 0x591   :  { %v1362_v22 = vmax.f32 %v1358_v18, 0.0  ;;  %v1363_v55 = vmax.f32 %v1359_v45, 0.0  ;;  %v1364_v29 = vmax.f32 %v1360_v16, 0.0  ;;  %v1365_v7 = vmax.f32 %v1361_v21, 0.0 }
 0x593   :  { %1366 = vst [vmem:[%s2758_s11] sm:$0xff] %v1362_v22  ;;  %1367 = vst [vmem:[%s2758_s11 + $0x8] sm:$0xff] %v1363_v55 }
 0x594   :  { %1368 = vst [vmem:[%s2758_s11 + $0x10] sm:$0xff] %v1364_v29  ;;  %1369 = vst [vmem:[%s2758_s11 + $0x18] sm:$0xff] %v1365_v7 }

</bundles_post_ra>
